<compile_context>
chip_gen: v7x
topology: tpu7x:2x2x1
jax: 0.10.0
libtpu: 0.0.40
codegen_flags: <defaults>
</compile_context>

<pallas_src>
import jax
import jax.numpy as jnp
from jax.experimental import pallas as pl
from jax.experimental.pallas import tpu as pltpu  # noqa: F401  (TPU-tuning hooks; unused at toy size)

# ----------------------------- model config ---------------------------------
BATCH = 2
SEQ = 8
HIDDEN = 32
NUM_HEADS = 4
HEAD_DIM = HIDDEN // NUM_HEADS
INTERMEDIATE = 64
NUM_LAYERS = 2
VOCAB = 100
TYPE_VOCAB = 2
MAX_POS = 16
LN_EPS = 1e-12
TOKENS = BATCH * SEQ
QKV_WIDTH = NUM_HEADS * HEAD_DIM          # 32
REFS_PER_LAYER = 12


# ----------------------------- shared math -----------------------------------
def _layernorm(x, gamma, beta):
    mean = jnp.mean(x, axis=-1, keepdims=True)
    var = jnp.mean((x - mean) ** 2, axis=-1, keepdims=True)
    return (x - mean) * jax.lax.rsqrt(var + LN_EPS) * gamma + beta


# ----------------------------- Pallas kernel ---------------------------------
def fused_encoder_kernel(*refs):
    """Refs: emb, attn_bias, emb_ln_g, emb_ln_b, <12 per layer>..., out."""
    emb_ref, bias_ref, emb_g_ref, emb_b_ref = refs[:4]
    out_ref = refs[-1]
    layer_refs = refs[4:-1]
    assert len(layer_refs) == NUM_LAYERS * REFS_PER_LAYER

    x = _layernorm(emb_ref[...], emb_g_ref[...], emb_b_ref[...])   # (T, H) lane-dense
    bias = bias_ref[...]                                           # (T, T), read ONCE, reused

    for li in range(NUM_LAYERS):
        (wqkv_ref, bqkv_ref, wo_ref, bo_ref, ln1g_ref, ln1b_ref,
         w1_ref, b1_ref, w2_ref, b2_ref, ln2g_ref, ln2b_ref) = layer_refs[
            li * REFS_PER_LAYER:(li + 1) * REFS_PER_LAYER]

        # --- fused, lane-dense QKV projection: one (T,32)@(32,96) MXU push ---
        # (HEAD_DIM**-0.5 is already folded into the q-columns of wqkv.)
        qkv = jnp.dot(x, wqkv_ref[...],
                      preferred_element_type=jnp.float32) + bqkv_ref[...]   # (T, 96)

        # --- per-head attention on small 2-D tiles ---------------------------
        ctx_heads = []
        for h in range(NUM_HEADS):
            q_h = qkv[:, h * HEAD_DIM:(h + 1) * HEAD_DIM]                       # (T, D)
            k_h = qkv[:, QKV_WIDTH + h * HEAD_DIM:QKV_WIDTH + (h + 1) * HEAD_DIM]
            v_h = qkv[:, 2 * QKV_WIDTH + h * HEAD_DIM:2 * QKV_WIDTH + (h + 1) * HEAD_DIM]

            # scores: q_h @ k_h^T  (contract the HEAD_DIM axis of both)
            s_h = jax.lax.dot_general(
                q_h, k_h, dimension_numbers=(((1,), (1,)), ((), ())),
                preferred_element_type=jnp.float32) + bias                       # (T, T)

            m_h = jnp.max(s_h, axis=-1, keepdims=True)
            p_h = jnp.exp(s_h - m_h)
            denom = jnp.sum(p_h, axis=-1, keepdims=True)
            p_h = p_h * pl.reciprocal(denom, approx=True)                        # EUP reciprocal

            ctx_heads.append(jnp.dot(p_h, v_h,
                                     preferred_element_type=jnp.float32))        # (T, D)

        # lane-concat per-head contexts -> lane-dense (T, 32)
        ctx = jnp.concatenate(ctx_heads, axis=1)

        # --- fused output projection: one (T,32)@(32,32) matmul --------------
        attn = jnp.dot(ctx, wo_ref[...],
                       preferred_element_type=jnp.float32) + bo_ref[...]

        h1 = _layernorm(x + attn, ln1g_ref[...], ln1b_ref[...])

        # --- FFN --------------------------------------------------------------
        ff = jnp.dot(h1, w1_ref[...], preferred_element_type=jnp.float32) + b1_ref[...]
        # TODO(synk): HF BERT defaults to exact erf GELU; tanh approximation kept.
        ff = jax.nn.gelu(ff, approximate=True)
        ff = jnp.dot(ff, w2_ref[...], preferred_element_type=jnp.float32) + b2_ref[...]

        x = _layernorm(h1 + ff, ln2g_ref[...], ln2b_ref[...])

    out_ref[...] = x


# ----------------------------- pallas_call wrapper ----------------------------
def pallas_fused_encoder(emb2d, attn_bias, emb_ln_g, emb_ln_b, layer_params):
    flat = []
    for layer in layer_params:
        flat.extend(layer)
    # No grid: one launch, every operand is a whole-array VMEM block.
    # TODO(synk): at real encoder sizes add a layer-streaming grid axis
    # (+ bf16 weights, vmem_limit_bytes) and a parallel token-block axis.
    return pl.pallas_call(
        fused_encoder_kernel,
        out_shape=jax.ShapeDtypeStruct((TOKENS, HIDDEN), jnp.float32),
    )(emb2d, attn_bias, emb_ln_g, emb_ln_b, *flat)


# ----------------------------- parameter init ---------------------------------
def init_params(key):
    def nrm(k, shape, std=0.02):
        return std * jax.random.normal(k, shape, dtype=jnp.float32)

    keys = jax.random.split(key, 4 + NUM_LAYERS)
    params = {
        "word_emb": nrm(keys[0], (VOCAB, HIDDEN)),
        "pos_emb": nrm(keys[1], (MAX_POS, HIDDEN)),
        "type_emb": nrm(keys[2], (TYPE_VOCAB, HIDDEN)),
        "emb_ln_g": jnp.ones((1, HIDDEN), jnp.float32),
        "emb_ln_b": jnp.zeros((1, HIDDEN), jnp.float32),
        "layers": [],
    }
    # attention scale folded into the q-columns of the fused QKV weight (free).
    qkv_col_scale = jnp.concatenate(
        [jnp.full((QKV_WIDTH,), HEAD_DIM ** -0.5, jnp.float32),
         jnp.ones((2 * QKV_WIDTH,), jnp.float32)]
    )[None, :]                                                    # (1, 96)

    for li in range(NUM_LAYERS):
        lkeys = jax.random.split(keys[4 + li], 4)
        wqkv = nrm(lkeys[0], (HIDDEN, 3 * QKV_WIDTH)) * qkv_col_scale   # (32, 96) lane-dense, q|k|v head-major
        bqkv = jnp.zeros((1, 3 * QKV_WIDTH), jnp.float32) * qkv_col_scale
        layer = (
            wqkv,                                                    # wqkv_flat
            bqkv,                                                    # bqkv_flat
            nrm(lkeys[1], (QKV_WIDTH, HIDDEN)),                      # wo_flat (NH*D, H)
            jnp.zeros((1, HIDDEN), jnp.float32),                     # bo
            jnp.ones((1, HIDDEN), jnp.float32),                      # ln1 gamma
            jnp.zeros((1, HIDDEN), jnp.float32),                     # ln1 beta
            nrm(lkeys[2], (HIDDEN, INTERMEDIATE)),                   # w1
            jnp.zeros((1, INTERMEDIATE), jnp.float32),               # b1
            nrm(lkeys[3], (INTERMEDIATE, HIDDEN)),                   # w2
            jnp.zeros((1, HIDDEN), jnp.float32),                     # b2
            jnp.ones((1, HIDDEN), jnp.float32),                      # ln2 gamma
            jnp.zeros((1, HIDDEN), jnp.float32),                     # ln2 beta
        )
        params["layers"].append(layer)
    return params


# ----------------------------- forward (== Transformer.forward) ---------------
@jax.jit
def transformer_forward(input_ids, attention_mask, token_type_ids, params):
    """Mirrors sentence_transformers Transformer.forward: returns features dict
    with 'token_embeddings' (last hidden state) and the original inputs."""
    B, S = input_ids.shape
    # Embedding gather is glue (plain JAX).
    pos_ids = jnp.arange(S, dtype=jnp.int32)[None, :]
    emb = (
        params["word_emb"][input_ids]
        + params["pos_emb"][pos_ids]
        + params["type_emb"][token_type_ids]
    ).astype(jnp.float32)
    emb2d = emb.reshape(B * S, HIDDEN)

    # Block-diagonal additive attention bias, precomputed once: token i may
    # attend to token j iff same batch row and key j is not padding.
    batch_idx = jnp.repeat(jnp.arange(B, dtype=jnp.int32), S)
    same_batch = batch_idx[:, None] == batch_idx[None, :]
    key_keep = attention_mask.reshape(-1) > 0
    attn_bias = jnp.where(same_batch & key_keep[None, :], 0.0, -1e9).astype(jnp.float32)

    out2d = pallas_fused_encoder(
        emb2d, attn_bias, params["emb_ln_g"], params["emb_ln_b"], params["layers"]
    )
    token_embeddings = out2d.reshape(B, S, HIDDEN)

    features = {
        "input_ids": input_ids,
        "attention_mask": attention_mask,
        "token_type_ids": token_type_ids,
        "token_embeddings": token_embeddings,
    }
    # TODO(synk): output_hidden_states / all_layer_embeddings path not emitted
    # (config.output_hidden_states assumed False, matching default HF configs).
    return features


# ----------------------------- pure-JAX reference -----------------------------
def reference_forward(input_ids, attention_mask, token_type_ids, params):
    B, S = input_ids.shape
    pos_ids = jnp.arange(S, dtype=jnp.int32)[None, :]
    emb = (
        params["word_emb"][input_ids]
        + params["pos_emb"][pos_ids]
        + params["type_emb"][token_type_ids]
    ).astype(jnp.float32)
    x = _layernorm(emb.reshape(B * S, HIDDEN), params["emb_ln_g"], params["emb_ln_b"])

    batch_idx = jnp.repeat(jnp.arange(B, dtype=jnp.int32), S)
    same_batch = batch_idx[:, None] == batch_idx[None, :]
    key_keep = attention_mask.reshape(-1) > 0
    bias = jnp.where(same_batch & key_keep[None, :], 0.0, -1e9).astype(jnp.float32)

    for (wqkv, bqkv, wo, bo, ln1g, ln1b, w1, b1, w2, b2, ln2g, ln2b) in params["layers"]:
        qkv = x @ wqkv + bqkv                                    # (T, 96), scale pre-folded
        q = qkv[:, :QKV_WIDTH].reshape(TOKENS, NUM_HEADS, HEAD_DIM).transpose(1, 0, 2)
        k = qkv[:, QKV_WIDTH:2 * QKV_WIDTH].reshape(TOKENS, NUM_HEADS, HEAD_DIM).transpose(1, 0, 2)
        v = qkv[:, 2 * QKV_WIDTH:].reshape(TOKENS, NUM_HEADS, HEAD_DIM).transpose(1, 0, 2)
        s = jnp.einsum("htd,hsd->hts", q, k) + bias[None]
        p = jax.nn.softmax(s, axis=-1)
        ctx = jnp.einsum("hts,hsd->htd", p, v)
        ctx_flat = ctx.transpose(1, 0, 2).reshape(TOKENS, QKV_WIDTH)
        attn = ctx_flat @ wo + bo
        h1 = _layernorm(x + attn, ln1g, ln1b)
        ff = jnp.dot(h1, w1) + b1
        ff = jax.nn.gelu(ff, approximate=True)
        ff = jnp.dot(ff, w2) + b2
        x = _layernorm(h1 + ff, ln2g, ln2b)
    return x.reshape(B, S, HIDDEN)


# ----------------------------- main -------------------------------------------
if __name__ == "__main__":
    key = jax.random.PRNGKey(0)
    pkey, dkey = jax.random.split(key)
    params = init_params(pkey)

    input_ids = jax.random.randint(dkey, (BATCH, SEQ), 0, VOCAB, dtype=jnp.int32)
    attention_mask = jnp.array(
        [[1] * SEQ, [1] * (SEQ - 3) + [0] * 3], dtype=jnp.int32
    )
    token_type_ids = jnp.zeros((BATCH, SEQ), dtype=jnp.int32)

    feats = transformer_forward(input_ids, attention_mask, token_type_ids, params)
    tok = jax.block_until_ready(feats["token_embeddings"])

    assert tok.shape == (BATCH, SEQ, HIDDEN)
    assert tok.dtype == jnp.float32
    assert bool(jnp.all(jnp.isfinite(tok)))

    ref = reference_forward(input_ids, attention_mask, token_type_ids, params)
    max_diff = float(jnp.max(jnp.abs(tok - ref)))
    assert max_diff < 5e-2, f"kernel/reference mismatch: max_diff={max_diff}"

    print("KERNEL_OK")
</pallas_src>

<mosaic_0001>
module attributes {stable_mosaic.version = 11 : i64} {
  func.func @fused_encoder_kernel(%arg0: memref<16x32xf32, #tpu.memory_space<vmem>>, %arg1: memref<16x16xf32, #tpu.memory_space<vmem>>, %arg2: memref<1x32xf32, #tpu.memory_space<vmem>>, %arg3: memref<1x32xf32, #tpu.memory_space<vmem>>, %arg4: memref<32x96xf32, #tpu.memory_space<vmem>>, %arg5: memref<1x96xf32, #tpu.memory_space<vmem>>, %arg6: memref<32x32xf32, #tpu.memory_space<vmem>>, %arg7: memref<1x32xf32, #tpu.memory_space<vmem>>, %arg8: memref<1x32xf32, #tpu.memory_space<vmem>>, %arg9: memref<1x32xf32, #tpu.memory_space<vmem>>, %arg10: memref<32x64xf32, #tpu.memory_space<vmem>>, %arg11: memref<1x64xf32, #tpu.memory_space<vmem>>, %arg12: memref<64x32xf32, #tpu.memory_space<vmem>>, %arg13: memref<1x32xf32, #tpu.memory_space<vmem>>, %arg14: memref<1x32xf32, #tpu.memory_space<vmem>>, %arg15: memref<1x32xf32, #tpu.memory_space<vmem>>, %arg16: memref<32x96xf32, #tpu.memory_space<vmem>>, %arg17: memref<1x96xf32, #tpu.memory_space<vmem>>, %arg18: memref<32x32xf32, #tpu.memory_space<vmem>>, %arg19: memref<1x32xf32, #tpu.memory_space<vmem>>, %arg20: memref<1x32xf32, #tpu.memory_space<vmem>>, %arg21: memref<1x32xf32, #tpu.memory_space<vmem>>, %arg22: memref<32x64xf32, #tpu.memory_space<vmem>>, %arg23: memref<1x64xf32, #tpu.memory_space<vmem>>, %arg24: memref<64x32xf32, #tpu.memory_space<vmem>>, %arg25: memref<1x32xf32, #tpu.memory_space<vmem>>, %arg26: memref<1x32xf32, #tpu.memory_space<vmem>>, %arg27: memref<1x32xf32, #tpu.memory_space<vmem>>, %arg28: memref<16x32xf32, #tpu.memory_space<vmem>>) attributes {dimension_semantics = [], scalar_prefetch = 0 : i64, scratch_operands = 0 : i64, tpu.core_type = #tpu.core_type<tc>} {
    %c0 = arith.constant 0 : index
    %c0_0 = arith.constant 0 : index
    %0 = vector.load %arg0[%c0, %c0_0] : memref<16x32xf32, #tpu.memory_space<vmem>>, vector<16x32xf32>
    %c0_1 = arith.constant 0 : index
    %c0_2 = arith.constant 0 : index
    %1 = vector.load %arg2[%c0_1, %c0_2] : memref<1x32xf32, #tpu.memory_space<vmem>>, vector<1x32xf32>
    %c0_3 = arith.constant 0 : index
    %c0_4 = arith.constant 0 : index
    %2 = vector.load %arg3[%c0_3, %c0_4] : memref<1x32xf32, #tpu.memory_space<vmem>>, vector<1x32xf32>
    %cst = arith.constant dense<0.000000e+00> : vector<16xf32>
    %3 = vector.multi_reduction <add>, %0, %cst [1] : vector<16x32xf32> to vector<16xf32>
    %4 = vector.shape_cast %3 : vector<16xf32> to vector<16x1xf32>
    %cst_5 = arith.constant 3.200000e+01 : f32
    %5 = vector.broadcast %cst_5 : f32 to vector<16x1xf32>
    %6 = arith.divf %4, %5 : vector<16x1xf32>
    %7 = vector.broadcast %6 : vector<16x1xf32> to vector<16x32xf32>
    %8 = arith.subf %0, %7 : vector<16x32xf32>
    %9 = arith.mulf %8, %8 : vector<16x32xf32>
    %cst_6 = arith.constant dense<0.000000e+00> : vector<16xf32>
    %10 = vector.multi_reduction <add>, %9, %cst_6 [1] : vector<16x32xf32> to vector<16xf32>
    %11 = vector.shape_cast %10 : vector<16xf32> to vector<16x1xf32>
    %cst_7 = arith.constant 3.200000e+01 : f32
    %12 = vector.broadcast %cst_7 : f32 to vector<16x1xf32>
    %13 = arith.divf %11, %12 : vector<16x1xf32>
    %14 = vector.broadcast %6 : vector<16x1xf32> to vector<16x32xf32>
    %15 = arith.subf %0, %14 : vector<16x32xf32>
    %cst_8 = arith.constant 9.99999996E-13 : f32
    %16 = vector.broadcast %cst_8 : f32 to vector<16x1xf32>
    %17 = arith.addf %13, %16 : vector<16x1xf32>
    %18 = math.rsqrt %17 : vector<16x1xf32>
    %19 = vector.broadcast %18 : vector<16x1xf32> to vector<16x32xf32>
    %20 = arith.mulf %15, %19 : vector<16x32xf32>
    %21 = vector.broadcast %1 : vector<1x32xf32> to vector<16x32xf32>
    %22 = arith.mulf %20, %21 : vector<16x32xf32>
    %23 = vector.broadcast %2 : vector<1x32xf32> to vector<16x32xf32>
    %24 = arith.addf %22, %23 : vector<16x32xf32>
    %c0_9 = arith.constant 0 : index
    %c0_10 = arith.constant 0 : index
    %25 = vector.load %arg1[%c0_9, %c0_10] : memref<16x16xf32, #tpu.memory_space<vmem>>, vector<16x16xf32>
    %c0_11 = arith.constant 0 : index
    %c0_12 = arith.constant 0 : index
    %26 = vector.load %arg4[%c0_11, %c0_12] : memref<32x96xf32, #tpu.memory_space<vmem>>, vector<32x96xf32>
    %cst_13 = arith.constant dense<0.000000e+00> : vector<16x96xf32>
    %27 = tpu.matmul %24, %26, %cst_13 {dimension_numbers = #tpu.dot_dimension_numbers<[1], [0], [0], [1], [0, 0, 1, 1], [], []>} : vector<16x32xf32>, vector<32x96xf32>, vector<16x96xf32> -> vector<16x96xf32>
    %c0_14 = arith.constant 0 : index
    %c0_15 = arith.constant 0 : index
    %28 = vector.load %arg5[%c0_14, %c0_15] : memref<1x96xf32, #tpu.memory_space<vmem>>, vector<1x96xf32>
    %29 = vector.broadcast %28 : vector<1x96xf32> to vector<16x96xf32>
    %30 = arith.addf %27, %29 : vector<16x96xf32>
    %31 = vector.extract_strided_slice %30 {offsets = [0, 0], sizes = [16, 8], strides = [1, 1]} : vector<16x96xf32> to vector<16x8xf32>
    %32 = vector.extract_strided_slice %30 {offsets = [0, 32], sizes = [16, 8], strides = [1, 1]} : vector<16x96xf32> to vector<16x8xf32>
    %33 = vector.extract_strided_slice %30 {offsets = [0, 64], sizes = [16, 8], strides = [1, 1]} : vector<16x96xf32> to vector<16x8xf32>
    %cst_16 = arith.constant dense<0.000000e+00> : vector<16x16xf32>
    %34 = tpu.matmul %31, %32, %cst_16 {dimension_numbers = #tpu.dot_dimension_numbers<[1], [1], [0], [0], [0, 0, 1, 0], [], []>} : vector<16x8xf32>, vector<16x8xf32>, vector<16x16xf32> -> vector<16x16xf32>
    %35 = arith.addf %34, %25 : vector<16x16xf32>
    %cst_17 = arith.constant dense<0xFF800000> : vector<16xf32>
    %36 = vector.multi_reduction <maximumf>, %35, %cst_17 [1] : vector<16x16xf32> to vector<16xf32>
    %37 = vector.shape_cast %36 : vector<16xf32> to vector<16x1xf32>
    %38 = vector.broadcast %37 : vector<16x1xf32> to vector<16x16xf32>
    %39 = arith.subf %35, %38 : vector<16x16xf32>
    %40 = math.exp %39 : vector<16x16xf32>
    %cst_18 = arith.constant dense<0.000000e+00> : vector<16xf32>
    %41 = vector.multi_reduction <add>, %40, %cst_18 [1] : vector<16x16xf32> to vector<16xf32>
    %42 = vector.shape_cast %41 : vector<16xf32> to vector<16x1xf32>
    %43 = tpu.reciprocal %42 {approx = true} : vector<16x1xf32> -> vector<16x1xf32>
    %44 = vector.broadcast %43 : vector<16x1xf32> to vector<16x16xf32>
    %45 = arith.mulf %40, %44 : vector<16x16xf32>
    %cst_19 = arith.constant dense<0.000000e+00> : vector<16x8xf32>
    %46 = tpu.matmul %45, %33, %cst_19 {dimension_numbers = #tpu.dot_dimension_numbers<[1], [0], [0], [1], [0, 0, 1, 1], [], []>} : vector<16x16xf32>, vector<16x8xf32>, vector<16x8xf32> -> vector<16x8xf32>
    %47 = vector.extract_strided_slice %30 {offsets = [0, 8], sizes = [16, 8], strides = [1, 1]} : vector<16x96xf32> to vector<16x8xf32>
    %48 = vector.extract_strided_slice %30 {offsets = [0, 40], sizes = [16, 8], strides = [1, 1]} : vector<16x96xf32> to vector<16x8xf32>
    %49 = vector.extract_strided_slice %30 {offsets = [0, 72], sizes = [16, 8], strides = [1, 1]} : vector<16x96xf32> to vector<16x8xf32>
    %cst_20 = arith.constant dense<0.000000e+00> : vector<16x16xf32>
    %50 = tpu.matmul %47, %48, %cst_20 {dimension_numbers = #tpu.dot_dimension_numbers<[1], [1], [0], [0], [0, 0, 1, 0], [], []>} : vector<16x8xf32>, vector<16x8xf32>, vector<16x16xf32> -> vector<16x16xf32>
    %51 = arith.addf %50, %25 : vector<16x16xf32>
    %cst_21 = arith.constant dense<0xFF800000> : vector<16xf32>
    %52 = vector.multi_reduction <maximumf>, %51, %cst_21 [1] : vector<16x16xf32> to vector<16xf32>
    %53 = vector.shape_cast %52 : vector<16xf32> to vector<16x1xf32>
    %54 = vector.broadcast %53 : vector<16x1xf32> to vector<16x16xf32>
    %55 = arith.subf %51, %54 : vector<16x16xf32>
    %56 = math.exp %55 : vector<16x16xf32>
    %cst_22 = arith.constant dense<0.000000e+00> : vector<16xf32>
    %57 = vector.multi_reduction <add>, %56, %cst_22 [1] : vector<16x16xf32> to vector<16xf32>
    %58 = vector.shape_cast %57 : vector<16xf32> to vector<16x1xf32>
    %59 = tpu.reciprocal %58 {approx = true} : vector<16x1xf32> -> vector<16x1xf32>
    %60 = vector.broadcast %59 : vector<16x1xf32> to vector<16x16xf32>
    %61 = arith.mulf %56, %60 : vector<16x16xf32>
    %cst_23 = arith.constant dense<0.000000e+00> : vector<16x8xf32>
    %62 = tpu.matmul %61, %49, %cst_23 {dimension_numbers = #tpu.dot_dimension_numbers<[1], [0], [0], [1], [0, 0, 1, 1], [], []>} : vector<16x16xf32>, vector<16x8xf32>, vector<16x8xf32> -> vector<16x8xf32>
    %63 = vector.extract_strided_slice %30 {offsets = [0, 16], sizes = [16, 8], strides = [1, 1]} : vector<16x96xf32> to vector<16x8xf32>
    %64 = vector.extract_strided_slice %30 {offsets = [0, 48], sizes = [16, 8], strides = [1, 1]} : vector<16x96xf32> to vector<16x8xf32>
    %65 = vector.extract_strided_slice %30 {offsets = [0, 80], sizes = [16, 8], strides = [1, 1]} : vector<16x96xf32> to vector<16x8xf32>
    %cst_24 = arith.constant dense<0.000000e+00> : vector<16x16xf32>
    %66 = tpu.matmul %63, %64, %cst_24 {dimension_numbers = #tpu.dot_dimension_numbers<[1], [1], [0], [0], [0, 0, 1, 0], [], []>} : vector<16x8xf32>, vector<16x8xf32>, vector<16x16xf32> -> vector<16x16xf32>
    %67 = arith.addf %66, %25 : vector<16x16xf32>
    %cst_25 = arith.constant dense<0xFF800000> : vector<16xf32>
    %68 = vector.multi_reduction <maximumf>, %67, %cst_25 [1] : vector<16x16xf32> to vector<16xf32>
    %69 = vector.shape_cast %68 : vector<16xf32> to vector<16x1xf32>
    %70 = vector.broadcast %69 : vector<16x1xf32> to vector<16x16xf32>
    %71 = arith.subf %67, %70 : vector<16x16xf32>
    %72 = math.exp %71 : vector<16x16xf32>
    %cst_26 = arith.constant dense<0.000000e+00> : vector<16xf32>
    %73 = vector.multi_reduction <add>, %72, %cst_26 [1] : vector<16x16xf32> to vector<16xf32>
    %74 = vector.shape_cast %73 : vector<16xf32> to vector<16x1xf32>
    %75 = tpu.reciprocal %74 {approx = true} : vector<16x1xf32> -> vector<16x1xf32>
    %76 = vector.broadcast %75 : vector<16x1xf32> to vector<16x16xf32>
    %77 = arith.mulf %72, %76 : vector<16x16xf32>
    %cst_27 = arith.constant dense<0.000000e+00> : vector<16x8xf32>
    %78 = tpu.matmul %77, %65, %cst_27 {dimension_numbers = #tpu.dot_dimension_numbers<[1], [0], [0], [1], [0, 0, 1, 1], [], []>} : vector<16x16xf32>, vector<16x8xf32>, vector<16x8xf32> -> vector<16x8xf32>
    %79 = vector.extract_strided_slice %30 {offsets = [0, 24], sizes = [16, 8], strides = [1, 1]} : vector<16x96xf32> to vector<16x8xf32>
    %80 = vector.extract_strided_slice %30 {offsets = [0, 56], sizes = [16, 8], strides = [1, 1]} : vector<16x96xf32> to vector<16x8xf32>
    %81 = vector.extract_strided_slice %30 {offsets = [0, 88], sizes = [16, 8], strides = [1, 1]} : vector<16x96xf32> to vector<16x8xf32>
    %cst_28 = arith.constant dense<0.000000e+00> : vector<16x16xf32>
    %82 = tpu.matmul %79, %80, %cst_28 {dimension_numbers = #tpu.dot_dimension_numbers<[1], [1], [0], [0], [0, 0, 1, 0], [], []>} : vector<16x8xf32>, vector<16x8xf32>, vector<16x16xf32> -> vector<16x16xf32>
    %83 = arith.addf %82, %25 : vector<16x16xf32>
    %cst_29 = arith.constant dense<0xFF800000> : vector<16xf32>
    %84 = vector.multi_reduction <maximumf>, %83, %cst_29 [1] : vector<16x16xf32> to vector<16xf32>
    %85 = vector.shape_cast %84 : vector<16xf32> to vector<16x1xf32>
    %86 = vector.broadcast %85 : vector<16x1xf32> to vector<16x16xf32>
    %87 = arith.subf %83, %86 : vector<16x16xf32>
    %88 = math.exp %87 : vector<16x16xf32>
    %cst_30 = arith.constant dense<0.000000e+00> : vector<16xf32>
    %89 = vector.multi_reduction <add>, %88, %cst_30 [1] : vector<16x16xf32> to vector<16xf32>
    %90 = vector.shape_cast %89 : vector<16xf32> to vector<16x1xf32>
    %91 = tpu.reciprocal %90 {approx = true} : vector<16x1xf32> -> vector<16x1xf32>
    %92 = vector.broadcast %91 : vector<16x1xf32> to vector<16x16xf32>
    %93 = arith.mulf %88, %92 : vector<16x16xf32>
    %cst_31 = arith.constant dense<0.000000e+00> : vector<16x8xf32>
    %94 = tpu.matmul %93, %81, %cst_31 {dimension_numbers = #tpu.dot_dimension_numbers<[1], [0], [0], [1], [0, 0, 1, 1], [], []>} : vector<16x16xf32>, vector<16x8xf32>, vector<16x8xf32> -> vector<16x8xf32>
    %95 = tpu.concatenate %46, %62, %78, %94 in 1 : vector<16x8xf32>, vector<16x8xf32>, vector<16x8xf32>, vector<16x8xf32> -> vector<16x32xf32>
    %c0_32 = arith.constant 0 : index
    %c0_33 = arith.constant 0 : index
    %96 = vector.load %arg6[%c0_32, %c0_33] : memref<32x32xf32, #tpu.memory_space<vmem>>, vector<32x32xf32>
    %cst_34 = arith.constant dense<0.000000e+00> : vector<16x32xf32>
    %97 = tpu.matmul %95, %96, %cst_34 {dimension_numbers = #tpu.dot_dimension_numbers<[1], [0], [0], [1], [0, 0, 1, 1], [], []>} : vector<16x32xf32>, vector<32x32xf32>, vector<16x32xf32> -> vector<16x32xf32>
    %c0_35 = arith.constant 0 : index
    %c0_36 = arith.constant 0 : index
    %98 = vector.load %arg7[%c0_35, %c0_36] : memref<1x32xf32, #tpu.memory_space<vmem>>, vector<1x32xf32>
    %99 = vector.broadcast %98 : vector<1x32xf32> to vector<16x32xf32>
    %100 = arith.addf %97, %99 : vector<16x32xf32>
    %101 = arith.addf %24, %100 : vector<16x32xf32>
    %c0_37 = arith.constant 0 : index
    %c0_38 = arith.constant 0 : index
    %102 = vector.load %arg8[%c0_37, %c0_38] : memref<1x32xf32, #tpu.memory_space<vmem>>, vector<1x32xf32>
    %c0_39 = arith.constant 0 : index
    %c0_40 = arith.constant 0 : index
    %103 = vector.load %arg9[%c0_39, %c0_40] : memref<1x32xf32, #tpu.memory_space<vmem>>, vector<1x32xf32>
    %cst_41 = arith.constant dense<0.000000e+00> : vector<16xf32>
    %104 = vector.multi_reduction <add>, %101, %cst_41 [1] : vector<16x32xf32> to vector<16xf32>
    %105 = vector.shape_cast %104 : vector<16xf32> to vector<16x1xf32>
    %cst_42 = arith.constant 3.200000e+01 : f32
    %106 = vector.broadcast %cst_42 : f32 to vector<16x1xf32>
    %107 = arith.divf %105, %106 : vector<16x1xf32>
    %108 = vector.broadcast %107 : vector<16x1xf32> to vector<16x32xf32>
    %109 = arith.subf %101, %108 : vector<16x32xf32>
    %110 = arith.mulf %109, %109 : vector<16x32xf32>
    %cst_43 = arith.constant dense<0.000000e+00> : vector<16xf32>
    %111 = vector.multi_reduction <add>, %110, %cst_43 [1] : vector<16x32xf32> to vector<16xf32>
    %112 = vector.shape_cast %111 : vector<16xf32> to vector<16x1xf32>
    %cst_44 = arith.constant 3.200000e+01 : f32
    %113 = vector.broadcast %cst_44 : f32 to vector<16x1xf32>
    %114 = arith.divf %112, %113 : vector<16x1xf32>
    %115 = vector.broadcast %107 : vector<16x1xf32> to vector<16x32xf32>
    %116 = arith.subf %101, %115 : vector<16x32xf32>
    %cst_45 = arith.constant 9.99999996E-13 : f32
    %117 = vector.broadcast %cst_45 : f32 to vector<16x1xf32>
    %118 = arith.addf %114, %117 : vector<16x1xf32>
    %119 = math.rsqrt %118 : vector<16x1xf32>
    %120 = vector.broadcast %119 : vector<16x1xf32> to vector<16x32xf32>
    %121 = arith.mulf %116, %120 : vector<16x32xf32>
    %122 = vector.broadcast %102 : vector<1x32xf32> to vector<16x32xf32>
    %123 = arith.mulf %121, %122 : vector<16x32xf32>
    %124 = vector.broadcast %103 : vector<1x32xf32> to vector<16x32xf32>
    %125 = arith.addf %123, %124 : vector<16x32xf32>
    %c0_46 = arith.constant 0 : index
    %c0_47 = arith.constant 0 : index
    %126 = vector.load %arg10[%c0_46, %c0_47] : memref<32x64xf32, #tpu.memory_space<vmem>>, vector<32x64xf32>
    %cst_48 = arith.constant dense<0.000000e+00> : vector<16x64xf32>
    %127 = tpu.matmul %125, %126, %cst_48 {dimension_numbers = #tpu.dot_dimension_numbers<[1], [0], [0], [1], [0, 0, 1, 1], [], []>} : vector<16x32xf32>, vector<32x64xf32>, vector<16x64xf32> -> vector<16x64xf32>
    %c0_49 = arith.constant 0 : index
    %c0_50 = arith.constant 0 : index
    %128 = vector.load %arg11[%c0_49, %c0_50] : memref<1x64xf32, #tpu.memory_space<vmem>>, vector<1x64xf32>
    %129 = vector.broadcast %128 : vector<1x64xf32> to vector<16x64xf32>
    %130 = arith.addf %127, %129 : vector<16x64xf32>
    %131 = arith.mulf %130, %130 : vector<16x64xf32>
    %132 = arith.mulf %130, %131 : vector<16x64xf32>
    %cst_51 = arith.constant 4.471500e-02 : f32
    %133 = vector.broadcast %cst_51 : f32 to vector<16x64xf32>
    %134 = arith.mulf %133, %132 : vector<16x64xf32>
    %135 = arith.addf %130, %134 : vector<16x64xf32>
    %cst_52 = arith.constant 0.797884583 : f32
    %136 = vector.broadcast %cst_52 : f32 to vector<16x64xf32>
    %137 = arith.mulf %136, %135 : vector<16x64xf32>
    %138 = math.tanh %137 : vector<16x64xf32>
    %cst_53 = arith.constant 1.000000e+00 : f32
    %139 = vector.broadcast %cst_53 : f32 to vector<16x64xf32>
    %140 = arith.addf %139, %138 : vector<16x64xf32>
    %cst_54 = arith.constant 5.000000e-01 : f32
    %141 = vector.broadcast %cst_54 : f32 to vector<16x64xf32>
    %142 = arith.mulf %141, %140 : vector<16x64xf32>
    %143 = arith.mulf %130, %142 : vector<16x64xf32>
    %c0_55 = arith.constant 0 : index
    %c0_56 = arith.constant 0 : index
    %144 = vector.load %arg12[%c0_55, %c0_56] : memref<64x32xf32, #tpu.memory_space<vmem>>, vector<64x32xf32>
    %cst_57 = arith.constant dense<0.000000e+00> : vector<16x32xf32>
    %145 = tpu.matmul %143, %144, %cst_57 {dimension_numbers = #tpu.dot_dimension_numbers<[1], [0], [0], [1], [0, 0, 1, 1], [], []>} : vector<16x64xf32>, vector<64x32xf32>, vector<16x32xf32> -> vector<16x32xf32>
    %c0_58 = arith.constant 0 : index
    %c0_59 = arith.constant 0 : index
    %146 = vector.load %arg13[%c0_58, %c0_59] : memref<1x32xf32, #tpu.memory_space<vmem>>, vector<1x32xf32>
    %147 = vector.broadcast %146 : vector<1x32xf32> to vector<16x32xf32>
    %148 = arith.addf %145, %147 : vector<16x32xf32>
    %149 = arith.addf %125, %148 : vector<16x32xf32>
    %c0_60 = arith.constant 0 : index
    %c0_61 = arith.constant 0 : index
    %150 = vector.load %arg14[%c0_60, %c0_61] : memref<1x32xf32, #tpu.memory_space<vmem>>, vector<1x32xf32>
    %c0_62 = arith.constant 0 : index
    %c0_63 = arith.constant 0 : index
    %151 = vector.load %arg15[%c0_62, %c0_63] : memref<1x32xf32, #tpu.memory_space<vmem>>, vector<1x32xf32>
    %cst_64 = arith.constant dense<0.000000e+00> : vector<16xf32>
    %152 = vector.multi_reduction <add>, %149, %cst_64 [1] : vector<16x32xf32> to vector<16xf32>
    %153 = vector.shape_cast %152 : vector<16xf32> to vector<16x1xf32>
    %cst_65 = arith.constant 3.200000e+01 : f32
    %154 = vector.broadcast %cst_65 : f32 to vector<16x1xf32>
    %155 = arith.divf %153, %154 : vector<16x1xf32>
    %156 = vector.broadcast %155 : vector<16x1xf32> to vector<16x32xf32>
    %157 = arith.subf %149, %156 : vector<16x32xf32>
    %158 = arith.mulf %157, %157 : vector<16x32xf32>
    %cst_66 = arith.constant dense<0.000000e+00> : vector<16xf32>
    %159 = vector.multi_reduction <add>, %158, %cst_66 [1] : vector<16x32xf32> to vector<16xf32>
    %160 = vector.shape_cast %159 : vector<16xf32> to vector<16x1xf32>
    %cst_67 = arith.constant 3.200000e+01 : f32
    %161 = vector.broadcast %cst_67 : f32 to vector<16x1xf32>
    %162 = arith.divf %160, %161 : vector<16x1xf32>
    %163 = vector.broadcast %155 : vector<16x1xf32> to vector<16x32xf32>
    %164 = arith.subf %149, %163 : vector<16x32xf32>
    %cst_68 = arith.constant 9.99999996E-13 : f32
    %165 = vector.broadcast %cst_68 : f32 to vector<16x1xf32>
    %166 = arith.addf %162, %165 : vector<16x1xf32>
    %167 = math.rsqrt %166 : vector<16x1xf32>
    %168 = vector.broadcast %167 : vector<16x1xf32> to vector<16x32xf32>
    %169 = arith.mulf %164, %168 : vector<16x32xf32>
    %170 = vector.broadcast %150 : vector<1x32xf32> to vector<16x32xf32>
    %171 = arith.mulf %169, %170 : vector<16x32xf32>
    %172 = vector.broadcast %151 : vector<1x32xf32> to vector<16x32xf32>
    %173 = arith.addf %171, %172 : vector<16x32xf32>
    %c0_69 = arith.constant 0 : index
    %c0_70 = arith.constant 0 : index
    %174 = vector.load %arg16[%c0_69, %c0_70] : memref<32x96xf32, #tpu.memory_space<vmem>>, vector<32x96xf32>
    %cst_71 = arith.constant dense<0.000000e+00> : vector<16x96xf32>
    %175 = tpu.matmul %173, %174, %cst_71 {dimension_numbers = #tpu.dot_dimension_numbers<[1], [0], [0], [1], [0, 0, 1, 1], [], []>} : vector<16x32xf32>, vector<32x96xf32>, vector<16x96xf32> -> vector<16x96xf32>
    %c0_72 = arith.constant 0 : index
    %c0_73 = arith.constant 0 : index
    %176 = vector.load %arg17[%c0_72, %c0_73] : memref<1x96xf32, #tpu.memory_space<vmem>>, vector<1x96xf32>
    %177 = vector.broadcast %176 : vector<1x96xf32> to vector<16x96xf32>
    %178 = arith.addf %175, %177 : vector<16x96xf32>
    %179 = vector.extract_strided_slice %178 {offsets = [0, 0], sizes = [16, 8], strides = [1, 1]} : vector<16x96xf32> to vector<16x8xf32>
    %180 = vector.extract_strided_slice %178 {offsets = [0, 32], sizes = [16, 8], strides = [1, 1]} : vector<16x96xf32> to vector<16x8xf32>
    %181 = vector.extract_strided_slice %178 {offsets = [0, 64], sizes = [16, 8], strides = [1, 1]} : vector<16x96xf32> to vector<16x8xf32>
    %cst_74 = arith.constant dense<0.000000e+00> : vector<16x16xf32>
    %182 = tpu.matmul %179, %180, %cst_74 {dimension_numbers = #tpu.dot_dimension_numbers<[1], [1], [0], [0], [0, 0, 1, 0], [], []>} : vector<16x8xf32>, vector<16x8xf32>, vector<16x16xf32> -> vector<16x16xf32>
    %183 = arith.addf %182, %25 : vector<16x16xf32>
    %cst_75 = arith.constant dense<0xFF800000> : vector<16xf32>
    %184 = vector.multi_reduction <maximumf>, %183, %cst_75 [1] : vector<16x16xf32> to vector<16xf32>
    %185 = vector.shape_cast %184 : vector<16xf32> to vector<16x1xf32>
    %186 = vector.broadcast %185 : vector<16x1xf32> to vector<16x16xf32>
    %187 = arith.subf %183, %186 : vector<16x16xf32>
    %188 = math.exp %187 : vector<16x16xf32>
    %cst_76 = arith.constant dense<0.000000e+00> : vector<16xf32>
    %189 = vector.multi_reduction <add>, %188, %cst_76 [1] : vector<16x16xf32> to vector<16xf32>
    %190 = vector.shape_cast %189 : vector<16xf32> to vector<16x1xf32>
    %191 = tpu.reciprocal %190 {approx = true} : vector<16x1xf32> -> vector<16x1xf32>
    %192 = vector.broadcast %191 : vector<16x1xf32> to vector<16x16xf32>
    %193 = arith.mulf %188, %192 : vector<16x16xf32>
    %cst_77 = arith.constant dense<0.000000e+00> : vector<16x8xf32>
    %194 = tpu.matmul %193, %181, %cst_77 {dimension_numbers = #tpu.dot_dimension_numbers<[1], [0], [0], [1], [0, 0, 1, 1], [], []>} : vector<16x16xf32>, vector<16x8xf32>, vector<16x8xf32> -> vector<16x8xf32>
    %195 = vector.extract_strided_slice %178 {offsets = [0, 8], sizes = [16, 8], strides = [1, 1]} : vector<16x96xf32> to vector<16x8xf32>
    %196 = vector.extract_strided_slice %178 {offsets = [0, 40], sizes = [16, 8], strides = [1, 1]} : vector<16x96xf32> to vector<16x8xf32>
    %197 = vector.extract_strided_slice %178 {offsets = [0, 72], sizes = [16, 8], strides = [1, 1]} : vector<16x96xf32> to vector<16x8xf32>
    %cst_78 = arith.constant dense<0.000000e+00> : vector<16x16xf32>
    %198 = tpu.matmul %195, %196, %cst_78 {dimension_numbers = #tpu.dot_dimension_numbers<[1], [1], [0], [0], [0, 0, 1, 0], [], []>} : vector<16x8xf32>, vector<16x8xf32>, vector<16x16xf32> -> vector<16x16xf32>
    %199 = arith.addf %198, %25 : vector<16x16xf32>
    %cst_79 = arith.constant dense<0xFF800000> : vector<16xf32>
    %200 = vector.multi_reduction <maximumf>, %199, %cst_79 [1] : vector<16x16xf32> to vector<16xf32>
    %201 = vector.shape_cast %200 : vector<16xf32> to vector<16x1xf32>
    %202 = vector.broadcast %201 : vector<16x1xf32> to vector<16x16xf32>
    %203 = arith.subf %199, %202 : vector<16x16xf32>
    %204 = math.exp %203 : vector<16x16xf32>
    %cst_80 = arith.constant dense<0.000000e+00> : vector<16xf32>
    %205 = vector.multi_reduction <add>, %204, %cst_80 [1] : vector<16x16xf32> to vector<16xf32>
    %206 = vector.shape_cast %205 : vector<16xf32> to vector<16x1xf32>
    %207 = tpu.reciprocal %206 {approx = true} : vector<16x1xf32> -> vector<16x1xf32>
    %208 = vector.broadcast %207 : vector<16x1xf32> to vector<16x16xf32>
    %209 = arith.mulf %204, %208 : vector<16x16xf32>
    %cst_81 = arith.constant dense<0.000000e+00> : vector<16x8xf32>
    %210 = tpu.matmul %209, %197, %cst_81 {dimension_numbers = #tpu.dot_dimension_numbers<[1], [0], [0], [1], [0, 0, 1, 1], [], []>} : vector<16x16xf32>, vector<16x8xf32>, vector<16x8xf32> -> vector<16x8xf32>
    %211 = vector.extract_strided_slice %178 {offsets = [0, 16], sizes = [16, 8], strides = [1, 1]} : vector<16x96xf32> to vector<16x8xf32>
    %212 = vector.extract_strided_slice %178 {offsets = [0, 48], sizes = [16, 8], strides = [1, 1]} : vector<16x96xf32> to vector<16x8xf32>
    %213 = vector.extract_strided_slice %178 {offsets = [0, 80], sizes = [16, 8], strides = [1, 1]} : vector<16x96xf32> to vector<16x8xf32>
    %cst_82 = arith.constant dense<0.000000e+00> : vector<16x16xf32>
    %214 = tpu.matmul %211, %212, %cst_82 {dimension_numbers = #tpu.dot_dimension_numbers<[1], [1], [0], [0], [0, 0, 1, 0], [], []>} : vector<16x8xf32>, vector<16x8xf32>, vector<16x16xf32> -> vector<16x16xf32>
    %215 = arith.addf %214, %25 : vector<16x16xf32>
    %cst_83 = arith.constant dense<0xFF800000> : vector<16xf32>
    %216 = vector.multi_reduction <maximumf>, %215, %cst_83 [1] : vector<16x16xf32> to vector<16xf32>
    %217 = vector.shape_cast %216 : vector<16xf32> to vector<16x1xf32>
    %218 = vector.broadcast %217 : vector<16x1xf32> to vector<16x16xf32>
    %219 = arith.subf %215, %218 : vector<16x16xf32>
    %220 = math.exp %219 : vector<16x16xf32>
    %cst_84 = arith.constant dense<0.000000e+00> : vector<16xf32>
    %221 = vector.multi_reduction <add>, %220, %cst_84 [1] : vector<16x16xf32> to vector<16xf32>
    %222 = vector.shape_cast %221 : vector<16xf32> to vector<16x1xf32>
    %223 = tpu.reciprocal %222 {approx = true} : vector<16x1xf32> -> vector<16x1xf32>
    %224 = vector.broadcast %223 : vector<16x1xf32> to vector<16x16xf32>
    %225 = arith.mulf %220, %224 : vector<16x16xf32>
    %cst_85 = arith.constant dense<0.000000e+00> : vector<16x8xf32>
    %226 = tpu.matmul %225, %213, %cst_85 {dimension_numbers = #tpu.dot_dimension_numbers<[1], [0], [0], [1], [0, 0, 1, 1], [], []>} : vector<16x16xf32>, vector<16x8xf32>, vector<16x8xf32> -> vector<16x8xf32>
    %227 = vector.extract_strided_slice %178 {offsets = [0, 24], sizes = [16, 8], strides = [1, 1]} : vector<16x96xf32> to vector<16x8xf32>
    %228 = vector.extract_strided_slice %178 {offsets = [0, 56], sizes = [16, 8], strides = [1, 1]} : vector<16x96xf32> to vector<16x8xf32>
    %229 = vector.extract_strided_slice %178 {offsets = [0, 88], sizes = [16, 8], strides = [1, 1]} : vector<16x96xf32> to vector<16x8xf32>
    %cst_86 = arith.constant dense<0.000000e+00> : vector<16x16xf32>
    %230 = tpu.matmul %227, %228, %cst_86 {dimension_numbers = #tpu.dot_dimension_numbers<[1], [1], [0], [0], [0, 0, 1, 0], [], []>} : vector<16x8xf32>, vector<16x8xf32>, vector<16x16xf32> -> vector<16x16xf32>
    %231 = arith.addf %230, %25 : vector<16x16xf32>
    %cst_87 = arith.constant dense<0xFF800000> : vector<16xf32>
    %232 = vector.multi_reduction <maximumf>, %231, %cst_87 [1] : vector<16x16xf32> to vector<16xf32>
    %233 = vector.shape_cast %232 : vector<16xf32> to vector<16x1xf32>
    %234 = vector.broadcast %233 : vector<16x1xf32> to vector<16x16xf32>
    %235 = arith.subf %231, %234 : vector<16x16xf32>
    %236 = math.exp %235 : vector<16x16xf32>
    %cst_88 = arith.constant dense<0.000000e+00> : vector<16xf32>
    %237 = vector.multi_reduction <add>, %236, %cst_88 [1] : vector<16x16xf32> to vector<16xf32>
    %238 = vector.shape_cast %237 : vector<16xf32> to vector<16x1xf32>
    %239 = tpu.reciprocal %238 {approx = true} : vector<16x1xf32> -> vector<16x1xf32>
    %240 = vector.broadcast %239 : vector<16x1xf32> to vector<16x16xf32>
    %241 = arith.mulf %236, %240 : vector<16x16xf32>
    %cst_89 = arith.constant dense<0.000000e+00> : vector<16x8xf32>
    %242 = tpu.matmul %241, %229, %cst_89 {dimension_numbers = #tpu.dot_dimension_numbers<[1], [0], [0], [1], [0, 0, 1, 1], [], []>} : vector<16x16xf32>, vector<16x8xf32>, vector<16x8xf32> -> vector<16x8xf32>
    %243 = tpu.concatenate %194, %210, %226, %242 in 1 : vector<16x8xf32>, vector<16x8xf32>, vector<16x8xf32>, vector<16x8xf32> -> vector<16x32xf32>
    %c0_90 = arith.constant 0 : index
    %c0_91 = arith.constant 0 : index
    %244 = vector.load %arg18[%c0_90, %c0_91] : memref<32x32xf32, #tpu.memory_space<vmem>>, vector<32x32xf32>
    %cst_92 = arith.constant dense<0.000000e+00> : vector<16x32xf32>
    %245 = tpu.matmul %243, %244, %cst_92 {dimension_numbers = #tpu.dot_dimension_numbers<[1], [0], [0], [1], [0, 0, 1, 1], [], []>} : vector<16x32xf32>, vector<32x32xf32>, vector<16x32xf32> -> vector<16x32xf32>
    %c0_93 = arith.constant 0 : index
    %c0_94 = arith.constant 0 : index
    %246 = vector.load %arg19[%c0_93, %c0_94] : memref<1x32xf32, #tpu.memory_space<vmem>>, vector<1x32xf32>
    %247 = vector.broadcast %246 : vector<1x32xf32> to vector<16x32xf32>
    %248 = arith.addf %245, %247 : vector<16x32xf32>
    %249 = arith.addf %173, %248 : vector<16x32xf32>
    %c0_95 = arith.constant 0 : index
    %c0_96 = arith.constant 0 : index
    %250 = vector.load %arg20[%c0_95, %c0_96] : memref<1x32xf32, #tpu.memory_space<vmem>>, vector<1x32xf32>
    %c0_97 = arith.constant 0 : index
    %c0_98 = arith.constant 0 : index
    %251 = vector.load %arg21[%c0_97, %c0_98] : memref<1x32xf32, #tpu.memory_space<vmem>>, vector<1x32xf32>
    %cst_99 = arith.constant dense<0.000000e+00> : vector<16xf32>
    %252 = vector.multi_reduction <add>, %249, %cst_99 [1] : vector<16x32xf32> to vector<16xf32>
    %253 = vector.shape_cast %252 : vector<16xf32> to vector<16x1xf32>
    %cst_100 = arith.constant 3.200000e+01 : f32
    %254 = vector.broadcast %cst_100 : f32 to vector<16x1xf32>
    %255 = arith.divf %253, %254 : vector<16x1xf32>
    %256 = vector.broadcast %255 : vector<16x1xf32> to vector<16x32xf32>
    %257 = arith.subf %249, %256 : vector<16x32xf32>
    %258 = arith.mulf %257, %257 : vector<16x32xf32>
    %cst_101 = arith.constant dense<0.000000e+00> : vector<16xf32>
    %259 = vector.multi_reduction <add>, %258, %cst_101 [1] : vector<16x32xf32> to vector<16xf32>
    %260 = vector.shape_cast %259 : vector<16xf32> to vector<16x1xf32>
    %cst_102 = arith.constant 3.200000e+01 : f32
    %261 = vector.broadcast %cst_102 : f32 to vector<16x1xf32>
    %262 = arith.divf %260, %261 : vector<16x1xf32>
    %263 = vector.broadcast %255 : vector<16x1xf32> to vector<16x32xf32>
    %264 = arith.subf %249, %263 : vector<16x32xf32>
    %cst_103 = arith.constant 9.99999996E-13 : f32
    %265 = vector.broadcast %cst_103 : f32 to vector<16x1xf32>
    %266 = arith.addf %262, %265 : vector<16x1xf32>
    %267 = math.rsqrt %266 : vector<16x1xf32>
    %268 = vector.broadcast %267 : vector<16x1xf32> to vector<16x32xf32>
    %269 = arith.mulf %264, %268 : vector<16x32xf32>
    %270 = vector.broadcast %250 : vector<1x32xf32> to vector<16x32xf32>
    %271 = arith.mulf %269, %270 : vector<16x32xf32>
    %272 = vector.broadcast %251 : vector<1x32xf32> to vector<16x32xf32>
    %273 = arith.addf %271, %272 : vector<16x32xf32>
    %c0_104 = arith.constant 0 : index
    %c0_105 = arith.constant 0 : index
    %274 = vector.load %arg22[%c0_104, %c0_105] : memref<32x64xf32, #tpu.memory_space<vmem>>, vector<32x64xf32>
    %cst_106 = arith.constant dense<0.000000e+00> : vector<16x64xf32>
    %275 = tpu.matmul %273, %274, %cst_106 {dimension_numbers = #tpu.dot_dimension_numbers<[1], [0], [0], [1], [0, 0, 1, 1], [], []>} : vector<16x32xf32>, vector<32x64xf32>, vector<16x64xf32> -> vector<16x64xf32>
    %c0_107 = arith.constant 0 : index
    %c0_108 = arith.constant 0 : index
    %276 = vector.load %arg23[%c0_107, %c0_108] : memref<1x64xf32, #tpu.memory_space<vmem>>, vector<1x64xf32>
    %277 = vector.broadcast %276 : vector<1x64xf32> to vector<16x64xf32>
    %278 = arith.addf %275, %277 : vector<16x64xf32>
    %279 = arith.mulf %278, %278 : vector<16x64xf32>
    %280 = arith.mulf %278, %279 : vector<16x64xf32>
    %cst_109 = arith.constant 4.471500e-02 : f32
    %281 = vector.broadcast %cst_109 : f32 to vector<16x64xf32>
    %282 = arith.mulf %281, %280 : vector<16x64xf32>
    %283 = arith.addf %278, %282 : vector<16x64xf32>
    %cst_110 = arith.constant 0.797884583 : f32
    %284 = vector.broadcast %cst_110 : f32 to vector<16x64xf32>
    %285 = arith.mulf %284, %283 : vector<16x64xf32>
    %286 = math.tanh %285 : vector<16x64xf32>
    %cst_111 = arith.constant 1.000000e+00 : f32
    %287 = vector.broadcast %cst_111 : f32 to vector<16x64xf32>
    %288 = arith.addf %287, %286 : vector<16x64xf32>
    %cst_112 = arith.constant 5.000000e-01 : f32
    %289 = vector.broadcast %cst_112 : f32 to vector<16x64xf32>
    %290 = arith.mulf %289, %288 : vector<16x64xf32>
    %291 = arith.mulf %278, %290 : vector<16x64xf32>
    %c0_113 = arith.constant 0 : index
    %c0_114 = arith.constant 0 : index
    %292 = vector.load %arg24[%c0_113, %c0_114] : memref<64x32xf32, #tpu.memory_space<vmem>>, vector<64x32xf32>
    %cst_115 = arith.constant dense<0.000000e+00> : vector<16x32xf32>
    %293 = tpu.matmul %291, %292, %cst_115 {dimension_numbers = #tpu.dot_dimension_numbers<[1], [0], [0], [1], [0, 0, 1, 1], [], []>} : vector<16x64xf32>, vector<64x32xf32>, vector<16x32xf32> -> vector<16x32xf32>
    %c0_116 = arith.constant 0 : index
    %c0_117 = arith.constant 0 : index
    %294 = vector.load %arg25[%c0_116, %c0_117] : memref<1x32xf32, #tpu.memory_space<vmem>>, vector<1x32xf32>
    %295 = vector.broadcast %294 : vector<1x32xf32> to vector<16x32xf32>
    %296 = arith.addf %293, %295 : vector<16x32xf32>
    %297 = arith.addf %273, %296 : vector<16x32xf32>
    %c0_118 = arith.constant 0 : index
    %c0_119 = arith.constant 0 : index
    %298 = vector.load %arg26[%c0_118, %c0_119] : memref<1x32xf32, #tpu.memory_space<vmem>>, vector<1x32xf32>
    %c0_120 = arith.constant 0 : index
    %c0_121 = arith.constant 0 : index
    %299 = vector.load %arg27[%c0_120, %c0_121] : memref<1x32xf32, #tpu.memory_space<vmem>>, vector<1x32xf32>
    %cst_122 = arith.constant dense<0.000000e+00> : vector<16xf32>
    %300 = vector.multi_reduction <add>, %297, %cst_122 [1] : vector<16x32xf32> to vector<16xf32>
    %301 = vector.shape_cast %300 : vector<16xf32> to vector<16x1xf32>
    %cst_123 = arith.constant 3.200000e+01 : f32
    %302 = vector.broadcast %cst_123 : f32 to vector<16x1xf32>
    %303 = arith.divf %301, %302 : vector<16x1xf32>
    %304 = vector.broadcast %303 : vector<16x1xf32> to vector<16x32xf32>
    %305 = arith.subf %297, %304 : vector<16x32xf32>
    %306 = arith.mulf %305, %305 : vector<16x32xf32>
    %cst_124 = arith.constant dense<0.000000e+00> : vector<16xf32>
    %307 = vector.multi_reduction <add>, %306, %cst_124 [1] : vector<16x32xf32> to vector<16xf32>
    %308 = vector.shape_cast %307 : vector<16xf32> to vector<16x1xf32>
    %cst_125 = arith.constant 3.200000e+01 : f32
    %309 = vector.broadcast %cst_125 : f32 to vector<16x1xf32>
    %310 = arith.divf %308, %309 : vector<16x1xf32>
    %311 = vector.broadcast %303 : vector<16x1xf32> to vector<16x32xf32>
    %312 = arith.subf %297, %311 : vector<16x32xf32>
    %cst_126 = arith.constant 9.99999996E-13 : f32
    %313 = vector.broadcast %cst_126 : f32 to vector<16x1xf32>
    %314 = arith.addf %310, %313 : vector<16x1xf32>
    %315 = math.rsqrt %314 : vector<16x1xf32>
    %316 = vector.broadcast %315 : vector<16x1xf32> to vector<16x32xf32>
    %317 = arith.mulf %312, %316 : vector<16x32xf32>
    %318 = vector.broadcast %298 : vector<1x32xf32> to vector<16x32xf32>
    %319 = arith.mulf %317, %318 : vector<16x32xf32>
    %320 = vector.broadcast %299 : vector<1x32xf32> to vector<16x32xf32>
    %321 = arith.addf %319, %320 : vector<16x32xf32>
    %c0_127 = arith.constant 0 : index
    %c0_128 = arith.constant 0 : index
    %322 = vector.load %arg28[%c0_127, %c0_128] : memref<16x32xf32, #tpu.memory_space<vmem>>, vector<16x32xf32>
    tpu.vector_store %arg28[%c0_127, %c0_128], %321 {strides = array<i32>} : memref<16x32xf32, #tpu.memory_space<vmem>>, vector<16x32xf32>,
    return
  }
}

</mosaic_0001>

<bundles_post_ra>
// kernel: transformer_forward.1
= control target key start
LH: loop header
LB: loop body
LE: loop exit
PB: predicated region body
PF: predicated region fallthrough
CT: control target
= control target key end

     0   :  { %s4236_s0 = inlined_call_operand.vmem [shape: f32[16,32], index: 0, kind: input, shape index: {}]   ;;  %s4237_s1 = inlined_call_operand.vmem [shape: f32[16,16], index: 1, kind: input, shape index: {}]   ;;  %s4238_s2 = inlined_call_operand.vmem [shape: f32[1,32], index: 2, kind: input, shape index: {}]   ;;  %s4239_s3 = inlined_call_operand.vmem [shape: f32[1,32], index: 3, kind: input, shape index: {}]   ;;  %s4240_s4 = inlined_call_operand.vmem [shape: f32[32,96], index: 4, kind: input, shape index: {}]   ;;  %s4241_s5 = inlined_call_operand.vmem [shape: f32[1,96], index: 5, kind: input, shape index: {}]   ;;  %s4242_s6 = inlined_call_operand.vmem [shape: f32[32,32], index: 6, kind: input, shape index: {}]   ;;  %s4243_s7 = inlined_call_operand.vmem [shape: f32[1,32], index: 7, kind: input, shape index: {}]   ;;  %s4244_s8 = inlined_call_operand.vmem [shape: f32[1,32], index: 8, kind: input, shape index: {}]   ;;  %s4245_s9 = inlined_call_operand.vmem [shape: f32[1,32], index: 9, kind: input, shape index: {}]   ;;  %s4246_s10 = inlined_call_operand.vmem [shape: f32[32,64], index: 10, kind: input, shape index: {}]   ;;  %s4247_s11 = inlined_call_operand.vmem [shape: f32[1,64], index: 11, kind: input, shape index: {}]   ;;  %s4248_s12 = inlined_call_operand.vmem [shape: f32[64,32], index: 12, kind: input, shape index: {}]   ;;  %s4249_s13 = inlined_call_operand.vmem [shape: f32[1,32], index: 13, kind: input, shape index: {}]   ;;  %s4250_s14 = inlined_call_operand.vmem [shape: f32[1,32], index: 14, kind: input, shape index: {}]   ;;  %s4251_s15 = inlined_call_operand.vmem [shape: f32[1,32], index: 15, kind: input, shape index: {}]   ;;  %s4252_s16 = inlined_call_operand.vmem [shape: f32[32,96], index: 16, kind: input, shape index: {}]   ;;  %s4253_s17 = inlined_call_operand.vmem [shape: f32[1,96], index: 17, kind: input, shape index: {}]   ;;  %s4254_s18 = inlined_call_operand.vmem [shape: f32[32,32], index: 18, kind: input, shape index: {}]   ;;  %s4255_s19 = inlined_call_operand.vmem [shape: f32[1,32], index: 19, kind: input, shape index: {}]   ;;  %s4256_s20 = inlined_call_operand.vmem [shape: f32[1,32], index: 20, kind: input, shape index: {}]   ;;  %s4257_s21 = inlined_call_operand.vmem [shape: f32[1,32], index: 21, kind: input, shape index: {}]   ;;  %s4258_s22 = inlined_call_operand.vmem [shape: f32[32,64], index: 22, kind: input, shape index: {}]   ;;  %s4259_s23 = inlined_call_operand.vmem [shape: f32[1,64], index: 23, kind: input, shape index: {}]   ;;  %s4260_s24 = inlined_call_operand.vmem [shape: f32[64,32], index: 24, kind: input, shape index: {}]   ;;  %s4261_s25 = inlined_call_operand.vmem [shape: f32[1,32], index: 25, kind: input, shape index: {}]   ;;  %s4262_s26 = inlined_call_operand.vmem [shape: f32[1,32], index: 26, kind: input, shape index: {}]   ;;  %s4263_s27 = inlined_call_operand.vmem [shape: f32[1,32], index: 27, kind: input, shape index: {}]   ;;  %s4264_s28 = inlined_call_operand.hbm [shape: f32[16,32], index: 28, kind: output, shape index: {}]  }
   0x1   :  { %4286 = sst [smem:[#allocation5_spill]] %s4236_s0 }
   0x2   :  { %4287 = sst [smem:[#allocation6_spill]] %s4237_s1 }
   0x3   :  { %4288 = sst [smem:[#allocation7_spill]] %s4238_s2 }
   0x4   :  { %4289 = sst [smem:[#allocation8_spill]] %s4239_s3 }
   0x5   :  { %4290 = sst [smem:[#allocation9_spill]] %s4240_s4 }
   0x6   :  { %4291 = sst [smem:[#allocation10_spill]] %s4241_s5 }
   0x7   :  { %4292 = sst [smem:[#allocation11_spill]] %s4242_s6 }
   0x8   :  { %4293 = sst [smem:[#allocation12_spill]] %s4243_s7 }
   0x9   :  { %4294 = sst [smem:[#allocation13_spill]] %s4244_s8 }
   0xa   :  { %4295 = sst [smem:[#allocation14_spill]] %s4245_s9 }
   0xb   :  { %4296 = sst [smem:[#allocation15_spill]] %s4246_s10 }
   0xc   :  { %4297 = sst [smem:[#allocation16_spill]] %s4247_s11 }
   0xd   :  { %4298 = sst [smem:[#allocation17_spill]] %s4248_s12 }
   0xe   :  { %s4299_s9 = sld [smem:[#allocation5_spill]]  ;;  %vm94_vm0 = vcmask 261120  }
  0x14   :  { %v90_v0 = vld [vmem:[%s4299_s9] sm:$0xff]  ;;  %v91_v1 = vld [vmem:[%s4299_s9 + $0x8] sm:$0xff] }
  0x15   :  { %33 = vsyncpa [#allocation3], 0  ;;  %v95_v2 = vsel %vm94_vm0, %v90_v0, 0.0  ;;  %v98_v3 = vsel %vm94_vm0, %v91_v1, 0.0  ;;  %s4300_s0 = sld [smem:[#allocation9_spill]]  ;;  %s4301_s5 = sld [smem:[#allocation7_spill]] }
  0x16   :  { %96 = vadd.xlane.f32.xlu0 %v95_v2  ;;  %s4302_s3 = sld [smem:[#allocation8_spill]]  ;;  %vm238_vm1 = vcmask 64512   ;;  %s3574_s11 = smov 88   ;;  %vm322_vm3 = vcmask 130048   ;;  %vm1060_vm4 = vcmask 195584   ;;  %vm1326_vm5 = vcmask 523264  }
  0x17   :  { %s3575_s29 = smov 96   ;;  %s3576_s2 = smov 120   ;;  %vm3794_vm2 = vmpackc.low %vm238_vm1, %vm238_vm1 }
  0x18   :  { %s4306_s1 = sld [smem:[#allocation6_spill]]  ;;  %s4285_s9 = smov 64  }
  0x19   :  { %s4282_s30 = smov 80   ;;  %s4279_s6 = smov 48  }
  0x1a   :  { %99 = vadd.xlane.f32.xlu0 %v98_v3  ;;  %s4275_s10 = smov 104   ;;  %s4273_s7 = smov 40  }
  0x1b   :  { %v140_v14 = vld [vmem:[%s4300_s0] sm:$0xff]  ;;  %v141_v15 = vld [vmem:[%s4300_s0 + $0x8] sm:$0xff]  ;;  %v142_v16 = vld [vmem:[%s4300_s0 + $0x10] sm:$0xff]  ;;  %s4277_s12 = smov 8   ;;  %s4271_s4 = smov 16  }
  0x1c   :  { %v3200_v17 = vpack.c.bf16 %v141_v15, %v140_v14  ;;  %v143_v18 = vld [vmem:[%s4300_s0 + $0x18] sm:$0xff]  ;;  %v2782_v27 = vld [vmem:[%s4301_s5] ss:$0 sm:$0xff]  ;;  %s4303_s0 = sld [smem:[#allocation10_spill]]  ;;  %s3577_s5 = smov 56  }
  0x1d   :  { %v3204_v19 = vpack.c.bf16 %v143_v18, %v142_v16  ;;  %v2783_v29 = vld [vmem:[%s4302_s3] ss:$0 sm:$0xff]  ;;  %s4280_s3 = smov 112   ;;  %s4320_s8 = smov 40  }
  0x1e   :  { %3201 = vmatprep.subr.bf16.mxu1 %v3200_v17  ;;  %v3813_v53 = vld [vmem:[%s4306_s1 + $0x8] sm:$0xff]  ;;  %v3818_v54 = vld [vmem:[%s4306_s1] sm:$0xff] }
  0x1f   :  { %3203 = vmatpush3.bf16.msra.mxu1 %v3200_v17 }
  0x20   :  { %3205 = vmatprep.subr.bf16.mxu1 %v3204_v19 }
  0x22   :  { %v2784_v36 = vld [vmem:[%s4303_s0] ss:$0 sm:$0xff]  ;;  %s4274_s0 = smov 72  }
  0x23   :  { %3207 = vmatpush3.bf16.msra.mxu1 %v3204_v19 }
  0xa3   :  { %v97_v4 = vpop.xlane.xlu0 %96 }
  0xa4   :  { %v102_v5 = vmul.f32 0.03125, %v97_v4 }
  0xa6   :  { %v104_v6 = vsub.f32 %v90_v0, %v102_v5 }
  0xa7   :  { %v100_v7 = vpop.xlane.xlu0 %99 }
  0xa8   :  { %v103_v8 = vmul.f32 0.03125, %v100_v7  ;;  %v106_v9 = vmul.f32 %v104_v6, %v104_v6 }
  0xaa   :  { %v105_v10 = vsub.f32 %v91_v1, %v103_v8  ;;  %v108_v11 = vsel %vm94_vm0, %v106_v9, 0.0 }
  0xab   :  { %109 = vadd.xlane.f32.xlu1 %v108_v11 }
  0xac   :  { %v107_v12 = vmul.f32 %v105_v10, %v105_v10 }
  0xae   :  { %v111_v13 = vsel %vm94_vm0, %v107_v12, 0.0 }
  0xaf   :  { %112 = vadd.xlane.f32.xlu1 %v111_v13 }
 0x138   :  { %v110_v20 = vpop.xlane.xlu1 %109 }
 0x139   :  { %v114_v21 = vmul.f32 0.03125, %v110_v20 }
 0x13b   :  { %v116_v22 = vadd.f32 1e-12, %v114_v21 }
 0x13c   :  { %v113_v23 = vpop.xlane.xlu1 %112 }
 0x13d   :  { %3456 = vrsqrt.f32 %v116_v22  ;;  %v115_v24 = vmul.f32 0.03125, %v113_v23 }
 0x13f   :  { %v117_v25 = vadd.f32 1e-12, %v115_v24 }
 0x141   :  { %3458 = vrsqrt.f32 %v117_v25 }
 0x147   :  { %v3457_v26 = vpop.eup %3456 }
 0x148   :  { %v120_v28 = vmul.f32 %v3457_v26, %v104_v6 }
 0x14a   :  { %v128_v30 = vmul.f32 %v2782_v27, %v120_v28 }
 0x14b   :  { %v3459_v31 = vpop.eup %3458 }
 0x14c   :  { %v121_v32 = vmul.f32 %v3459_v31, %v105_v10  ;;  %v3763_v33 = vadd.f32 %v2783_v29, %v128_v30 }
 0x14e   :  { %v129_v34 = vmul.f32 %v2782_v27, %v121_v32  ;;  %2992 = vmatprep.mubr.msk.f32.mxu1 %vm94_vm0, %v3763_v33 }
 0x150   :  { %v3767_v35 = vadd.f32 %v2783_v29, %v129_v34 }
 0x152   :  { %2993 = vmatmul.mubr.msk.f32.vlgmr.msra.gmra.mrb[0].mxu1 %vm94_vm0, %v3767_v35 }
 0x225   :  { %v2994_v37 = vpop.f32.mrb[0].mxu1 }
 0x226   :  { %v3774_v38 = vadd.f32 %v2994_v37, %v2784_v36  ;;  %v223_v39 = vpop.f32.mrb[1].mxu1 }
 0x227   :  { %v3776_v40 = vadd.f32 %v2784_v36, %v223_v39 }
 0x229   :  { %2999 = vmatprep.mubr.msk.f32.mxu1 %vm238_vm1, %v3776_v40  ;;  %v3782_v41 = vpack.i.bf16 %v3774_v38, %v3776_v40 }
 0x22b   :  { %3382 = vrot.lane.b32.xlu1 %v3782_v41, %s3574_s11  ;;  %3377 = vrot.lane.b32.xlu0 %v3782_v41, %s3575_s29 }
 0x22f   :  { %432 = vrot.lane.b32.xlu1 %v3776_v40, %s3576_s2 }
 0x233   :  { %434 = vrot.lane.b32.xlu1 %v3774_v38, %s3576_s2 }
 0x29d   :  { %v3383_v42 = vpop.permute.xlu1 %3382  ;;  %v3378_v43 = vpop.permute.xlu0 %3377 }
 0x29e   :  { %v3385_v44 = vunpack.i.h.bf16 %v3383_v42  ;;  %v3384_v45 = vunpack.i.l.bf16 %v3383_v42  ;;  %v3380_v46 = vunpack.i.h.bf16 %v3378_v43  ;;  %v3379_v47 = vunpack.i.l.bf16 %v3378_v43 }
 0x2a0   :  { %v3208_v49 = vpack.c.bf16 %v3380_v46, %v3379_v47  ;;  %v3218_v50 = vpack.c.bf16 %v3385_v44, %v3384_v45 }
 0x2a1   :  { %v433_v51 = vpop.permute.xlu1 %432 }
 0x2a2   :  { %3210 = vmatprep.subr.msk.bf16.mxu1 %vm3794_vm2, %v3208_v49 }
 0x2a3   :  { %3213 = vmatpush3.bf16.xpose.msk.msra.mxu1 %vm3794_vm2, %v3208_v49 }
 0x2a4   :  { %3220 = vmatprep.subr.msk.bf16.mxu1 %vm3794_vm2, %v3218_v50 }
 0x2a5   :  { %v435_v52 = vpop.permute.xlu1 %434 }
 0x2aa   :  { %3000 = vmatmul.mubr.msk.f32.vlgmr.msra.gmra.mrb[2].mxu1 %vm238_vm1, %v3774_v38 }
 0x2ab   :  { %3223 = vmatpush3.bf16.xpose.msk.msra.mxu1 %vm3794_vm2, %v3218_v50  ;;  %3013 = vmatprep.mubr.msk.f32.mxu1 %vm238_vm1, %v433_v51 }
 0x2b2   :  { %3014 = vmatmul.mubr.msk.f32.vlgmr.msra.gmra.mrb[4].mxu1 %vm238_vm1, %v435_v52 }
 0x37d   :  { %v3001_v55 = vpop.f32.mrb[2].mxu1 }
 0x37e   :  { %v319_v56 = vadd.f32 %v3001_v55, %v3813_v53  ;;  %v313_v57 = vpop.f32.mrb[3].mxu1 }
 0x37f   :  { %v314_v58 = vadd.f32 %v313_v57, %v3818_v54 }
 0x380   :  { %v326_v59 = vsel %vm322_vm3, %v319_v56, -inf }
 0x381   :  { %327 = vmax.xlane.f32.xlu1 %v326_v59  ;;  %v323_v60 = vsel %vm322_vm3, %v314_v58, -inf }
 0x382   :  { %324 = vmax.xlane.f32.xlu0 %v323_v60 }
 0x385   :  { %v3015_v61 = vpop.f32.mrb[4].mxu1 }
 0x386   :  { %v514_v62 = vpop.f32.mrb[5].mxu1  ;;  %v520_v0 = vadd.f32 %v3015_v61, %v3813_v53 }
 0x387   :  { %v515_v63 = vadd.f32 %v514_v62, %v3818_v54 }
 0x388   :  { %v526_v2 = vsel %vm322_vm3, %v520_v0, -inf }
 0x389   :  { %v523_v1 = vsel %vm322_vm3, %v515_v63, -inf }
 0x38a   :  { %524 = vmax.xlane.f32.xlu0 %v523_v1 }
 0x38e   :  { %527 = vmax.xlane.f32.xlu0 %v526_v2 }
 0x40e   :  { %v328_v3 = vpop.xlane.xlu1 %327 }
 0x40f   :  { %v330_v4 = vsub.f32 %v319_v56, %v328_v3  ;;  %v325_v5 = vpop.xlane.xlu0 %324 }
 0x410   :  { %v329_v6 = vsub.f32 %v314_v58, %v325_v5 }
 0x411   :  { %v333_v7 = vmul.f32 1.442695, %v330_v4 }
 0x412   :  { %v331_v8 = vmul.f32 1.442695, %v329_v6 }
 0x413   :  { %3460 = vpow2.f32 %v333_v7 }
 0x414   :  { %3462 = vpow2.f32 %v331_v8 }
 0x417   :  { %v525_v9 = vpop.xlane.xlu0 %524 }
 0x418   :  { %v529_v10 = vsub.f32 %v515_v63, %v525_v9 }
 0x41a   :  { %v531_v11 = vmul.f32 1.442695, %v529_v10 }
 0x41b   :  { %v528_v12 = vpop.xlane.xlu0 %527 }
 0x41c   :  { %3464 = vpow2.f32 %v531_v11  ;;  %v530_v13 = vsub.f32 %v520_v0, %v528_v12 }
 0x41d   :  { %v3461_v14 = vpop.eup %3460 }
 0x41e   :  { %v3463_v15 = vpop.eup %3462  ;;  %v533_v16 = vmul.f32 1.442695, %v530_v13  ;;  %v338_v17 = vsel %vm322_vm3, %v3461_v14, 0.0 }
 0x41f   :  { %339 = vadd.xlane.f32.xlu1 %v338_v17  ;;  %v335_v18 = vsel %vm322_vm3, %v3463_v15, 0.0 }
 0x420   :  { %3466 = vpow2.f32 %v533_v16  ;;  %336 = vadd.xlane.f32.xlu0 %v335_v18 }
 0x426   :  { %v3465_v19 = vpop.eup %3464 }
 0x427   :  { %v535_v20 = vsel %vm322_vm3, %v3465_v19, 0.0 }
 0x428   :  { %536 = vadd.xlane.f32.xlu0 %v535_v20 }
 0x42a   :  { %v3467_v21 = vpop.eup %3466 }
 0x42b   :  { %v538_v22 = vsel %vm322_vm3, %v3467_v21, 0.0 }
 0x42c   :  { %539 = vadd.xlane.f32.xlu1 %v538_v22 }
 0x43d   :  { %3392 = vrot.lane.b32.xlu1 %v3782_v41, %s3577_s5 }
 0x43e   :  { %3387 = vrot.lane.b32.xlu0 %v3782_v41, %s4285_s9  ;;  %s4313_s9 = sld [smem:[#allocation16_spill]] }
 0x441   :  { %3397 = vrot.lane.b32.xlu1 %v3782_v41, %s4282_s30 }
 0x442   :  { %634 = vrot.lane.b32.xlu0 %v3774_v38, %s4280_s3 }
 0x445   :  { %632 = vrot.lane.b32.xlu1 %v3776_v40, %s4280_s3 }
 0x4ac   :  { %v340_v24 = vpop.xlane.xlu1 %339 }
 0x4ad   :  { %v337_v23 = vpop.xlane.xlu0 %336 }
 0x4ae   :  { %3468 = vrcp.f32 %v337_v23 }
 0x4af   :  { %3470 = vrcp.f32 %v340_v24 }
 0x4b5   :  { %v537_v25 = vpop.xlane.xlu0 %536 }
 0x4b6   :  { %3472 = vrcp.f32 %v537_v25 }
 0x4b8   :  { %v3469_v26 = vpop.eup %3468 }
 0x4b9   :  { %v540_v27 = vpop.xlane.xlu1 %539  ;;  %v3388_v28 = vpop.permute.xlu0 %3387  ;;  %v343_v29 = vmul.f32 %v3469_v26, %v3463_v15 }
 0x4ba   :  { %3474 = vrcp.f32 %v540_v27  ;;  %v3390_v30 = vunpack.i.h.bf16 %v3388_v28  ;;  %v3389_v31 = vunpack.i.l.bf16 %v3388_v28  ;;  %v3471_v34 = vpop.eup %3470 }
 0x4bb   :  { %3006 = vmatprep.mubr.msk.f32.mxu0 %vm322_vm3, %v343_v29  ;;  %v344_v44 = vmul.f32 %v3471_v34, %v3461_v14 }
 0x4bc   :  { %v3214_v32 = vpack.c.bf16 %v3390_v30, %v3389_v31 }
 0x4bd   :  { %v3393_v36 = vpop.permute.xlu1 %3392  ;;  %v635_v56 = vpop.permute.xlu0 %634 }
 0x4be   :  { %v3395_v37 = vunpack.i.h.bf16 %v3393_v36  ;;  %v3394_v39 = vunpack.i.l.bf16 %v3393_v36  ;;  %3215 = vmatprep.subr.bf16.mxu0 %v3214_v32 }
 0x4bf   :  { %3217 = vmatpush3.bf16.msra.mxu0 %v3214_v32 }
 0x4c0   :  { %v3473_v42 = vpop.eup %3472  ;;  %v3224_v43 = vpack.c.bf16 %v3395_v37, %v3394_v39 }
 0x4c1   :  { %v3398_v45 = vpop.permute.xlu1 %3397  ;;  %v543_v46 = vmul.f32 %v3473_v42, %v3465_v19 }
 0x4c2   :  { %v3400_v47 = vunpack.i.h.bf16 %v3398_v45  ;;  %v3399_v49 = vunpack.i.l.bf16 %v3398_v45  ;;  %3007 = vmatmul.mubr.msk.f32.vlgmr.msra.gmra.mrb[0].mxu0 %vm322_vm3, %v344_v44  ;;  %3225 = vmatprep.subr.bf16.mxu0 %v3224_v43 }
 0x4c3   :  { %3227 = vmatpush3.bf16.msra.mxu0 %v3224_v43  ;;  %3020 = vmatprep.mubr.msk.f32.mxu0 %vm322_vm3, %v543_v46 }
 0x4c4   :  { %v3475_v50 = vpop.eup %3474  ;;  %v3228_v51 = vpack.c.bf16 %v3400_v47, %v3399_v49 }
 0x4c5   :  { %v544_v52 = vmul.f32 %v3475_v50, %v3467_v21  ;;  %v633_v55 = vpop.permute.xlu1 %632 }
 0x4c6   :  { %3230 = vmatprep.subr.msk.bf16.mxu0 %vm3794_vm2, %v3228_v51 }
 0x4c7   :  { %3021 = vmatmul.mubr.msk.f32.vlgmr.msra.gmra.mrb[2].mxu0 %vm322_vm3, %v544_v52 }
 0x4c8   :  { %3027 = vmatprep.mubr.msk.f32.mxu0 %vm238_vm1, %v633_v55 }
 0x4cc   :  { %3233 = vmatpush3.bf16.xpose.msk.msra.mxu0 %vm3794_vm2, %v3228_v51 }
 0x4d3   :  { %3028 = vmatmul.mubr.msk.f32.vlgmr.msra.gmra.mrb[4].mxu0 %vm238_vm1, %v635_v56 }
 0x595   :  { %v3852_v57 = vpop.f32.mrb[0].mxu0 }
 0x596   :  { %v3854_v58 = vpop.f32.mrb[1].mxu0 }
 0x59a   :  { %v3856_v59 = vpop.f32.mrb[2].mxu0 }
 0x59b   :  { %v3858_v60 = vpop.f32.mrb[3].mxu0 }
 0x5a6   :  { %v3029_v61 = vpop.f32.mrb[4].mxu0 }
 0x5a7   :  { %v720_v62 = vadd.f32 %v3029_v61, %v3813_v53  ;;  %v714_v63 = vpop.f32.mrb[5].mxu0 }
 0x5a8   :  { %v715_v0 = vadd.f32 %v714_v63, %v3818_v54 }
 0x5a9   :  { %v726_v1 = vsel %vm322_vm3, %v720_v62, -inf }
 0x5aa   :  { %727 = vmax.xlane.f32.xlu0 %v726_v1  ;;  %v723_v2 = vsel %vm322_vm3, %v715_v0, -inf }
 0x5ab   :  { %724 = vmax.xlane.f32.xlu1 %v723_v2 }
 0x5bc   :  { %3402 = vrot.lane.b32.xlu1 %v3782_v41, %s4279_s6  ;;  %s4308_s6 = sld [smem:[#allocation12_spill]] }
 0x5c0   :  { %832 = vrot.lane.b32.xlu1 %v3776_v40, %s4275_s10 }
 0x5c4   :  { %834 = vrot.lane.b32.xlu1 %v3774_v38, %s4275_s10 }
 0x637   :  { %v728_v3 = vpop.xlane.xlu0 %727 }
 0x638   :  { %v730_v4 = vsub.f32 %v720_v62, %v728_v3  ;;  %v725_v5 = vpop.xlane.xlu1 %724 }
 0x639   :  { %v729_v6 = vsub.f32 %v715_v0, %v725_v5 }
 0x63a   :  { %v733_v7 = vmul.f32 1.442695, %v730_v4 }
 0x63b   :  { %v731_v8 = vmul.f32 1.442695, %v729_v6 }
 0x63c   :  { %3476 = vpow2.f32 %v733_v7  ;;  %v3403_v9 = vpop.permute.xlu1 %3402 }
 0x63d   :  { %v3405_v10 = vunpack.i.h.bf16 %v3403_v9  ;;  %v3404_v11 = vunpack.i.l.bf16 %v3403_v9  ;;  %3478 = vpow2.f32 %v731_v8 }
 0x63f   :  { %v3234_v12 = vpack.c.bf16 %v3405_v10, %v3404_v11 }
 0x640   :  { %v833_v25 = vpop.permute.xlu1 %832 }
 0x641   :  { %3235 = vmatprep.subr.bf16.mxu1 %v3234_v12 }
 0x642   :  { %3237 = vmatpush3.bf16.msra.mxu1 %v3234_v12 }
 0x644   :  { %v835_v26 = vpop.permute.xlu1 %834 }
 0x646   :  { %v3477_v13 = vpop.eup %3476 }
 0x647   :  { %v738_v40 = vsel %vm322_vm3, %v3477_v13, 0.0  ;;  %v3479_v14 = vpop.eup %3478 }
 0x648   :  { %739 = vadd.xlane.f32.xlu0 %v738_v40  ;;  %v735_v38 = vsel %vm322_vm3, %v3479_v14, 0.0 }
 0x64c   :  { %736 = vadd.xlane.f32.xlu0 %v735_v38 }
 0x662   :  { %3407 = vrot.lane.b32.xlu0 %v3782_v41, %s4274_s0  ;;  %s4317_s0 = smov 48  }
 0x6d5   :  { %v740_v15 = vpop.xlane.xlu0 %739 }
 0x6d6   :  { %3480 = vrcp.f32 %v740_v15 }
 0x6d9   :  { %v737_v16 = vpop.xlane.xlu0 %736 }
 0x6da   :  { %3482 = vrcp.f32 %v737_v16 }
 0x6dd   :  { %v3408_v17 = vpop.permute.xlu0 %3407 }
 0x6de   :  { %v3410_v18 = vunpack.i.h.bf16 %v3408_v17  ;;  %v3409_v19 = vunpack.i.l.bf16 %v3408_v17 }
 0x6e0   :  { %v3238_v20 = vpack.c.bf16 %v3410_v18, %v3409_v19  ;;  %v3481_v21 = vpop.eup %3480 }
 0x6e1   :  { %v744_v24 = vmul.f32 %v3481_v21, %v3477_v13 }
 0x6e2   :  { %3240 = vmatprep.subr.msk.bf16.mxu1 %vm3794_vm2, %v3238_v20 }
 0x6e4   :  { %v3483_v22 = vpop.eup %3482 }
 0x6e5   :  { %v743_v23 = vmul.f32 %v3483_v22, %v3479_v14 }
 0x6e7   :  { %3034 = vmatprep.mubr.msk.f32.mxu1 %vm322_vm3, %v743_v23 }
 0x6e8   :  { %3035 = vmatmul.mubr.msk.f32.vlgmr.msra.gmra.mrb[6].mxu1 %vm322_vm3, %v744_v24 }
 0x6e9   :  { %3243 = vmatpush3.bf16.xpose.msk.msra.mxu1 %vm3794_vm2, %v3238_v20  ;;  %3041 = vmatprep.mubr.msk.f32.mxu1 %vm238_vm1, %v833_v25 }
 0x6f0   :  { %3042 = vmatmul.mubr.msk.f32.vlgmr.msra.gmra.mrb[8].mxu1 %vm238_vm1, %v835_v26 }
 0x7bb   :  { %v3036_v27 = vpop.f32.mrb[6].mxu1 }
 0x7bc   :  { %v823_v28 = vpop.f32.mrb[7].mxu1 }
 0x7c3   :  { %v3043_v29 = vpop.f32.mrb[8].mxu1 }
 0x7c4   :  { %v920_v30 = vadd.f32 %v3043_v29, %v3813_v53  ;;  %v914_v31 = vpop.f32.mrb[9].mxu1 }
 0x7c5   :  { %v915_v32 = vadd.f32 %v914_v31, %v3818_v54 }
 0x7c6   :  { %v926_v34 = vsel %vm322_vm3, %v920_v30, -inf }
 0x7c7   :  { %927 = vmax.xlane.f32.xlu0 %v926_v34  ;;  %v923_v36 = vsel %vm322_vm3, %v915_v32, -inf }
 0x7c8   :  { %924 = vmax.xlane.f32.xlu1 %v923_v36 }
 0x7d9   :  { %3412 = vrot.lane.b32.xlu1 %v3782_v41, %s4273_s7  ;;  %s4307_s7 = sld [smem:[#allocation11_spill]] }
 0x7dd   :  { %1036 = vrot.lane.b32.xlu1 %v3856_v59, %s4277_s12 }
 0x7df   :  { %v1063_v1 = vld [vmem:[%s4307_s7] sm:$0xff]  ;;  %v1065_v2 = vld [vmem:[%s4307_s7 + $0x10] sm:$0xff]  ;;  %v1066_v4 = vld [vmem:[%s4307_s7 + $0x18] sm:$0xff] }
 0x7e0   :  { %v3252_v5 = vpack.c.bf16 %v1066_v4, %v1065_v2 }
 0x7e1   :  { %1042 = vrot.lane.b32.xlu1 %v823_v28, %s4271_s4 }
 0x7e5   :  { %1044 = vrot.lane.b32.xlu1 %v3036_v27, %s4271_s4  ;;  %s4283_s4 = smov 24  }
 0x854   :  { %v928_v37 = vpop.xlane.xlu0 %927 }
 0x855   :  { %v930_v39 = vsub.f32 %v920_v30, %v928_v37  ;;  %v925_v42 = vpop.xlane.xlu1 %924 }
 0x856   :  { %v929_v43 = vsub.f32 %v915_v32, %v925_v42 }
 0x857   :  { %v933_v44 = vmul.f32 1.442695, %v930_v39 }
 0x858   :  { %v931_v45 = vmul.f32 1.442695, %v929_v43 }
 0x859   :  { %v3413_v46 = vpop.permute.xlu1 %3412 }
 0x85a   :  { %3484 = vpow2.f32 %v931_v45  ;;  %v3415_v47 = vunpack.i.h.bf16 %v3413_v46  ;;  %v3414_v49 = vunpack.i.l.bf16 %v3413_v46 }
 0x85b   :  { %3486 = vpow2.f32 %v933_v44 }
 0x85c   :  { %v3244_v41 = vpack.c.bf16 %v3415_v47, %v3414_v49 }
 0x85d   :  { %v1037_v8 = vpop.permute.xlu1 %1036 }
 0x85e   :  { %3245 = vmatprep.subr.bf16.mxu0 %v3244_v41  ;;  %v1057_v40 = vsel %vm238_vm1, %v3852_v57, %v1037_v8 }
 0x85f   :  { %3247 = vmatpush3.bf16.msra.mxu0 %v3244_v41 }
 0x861   :  { %v1043_v9 = vpop.permute.xlu1 %1042 }
 0x864   :  { %v3485_v50 = vpop.eup %3484 }
 0x865   :  { %v935_v51 = vsel %vm322_vm3, %v3485_v50, 0.0  ;;  %v3487_v52 = vpop.eup %3486  ;;  %v1045_v11 = vpop.permute.xlu1 %1044 }
 0x866   :  { %936 = vadd.xlane.f32.xlu0 %v935_v51  ;;  %v938_v55 = vsel %vm322_vm3, %v3487_v52, 0.0  ;;  %v1059_v15 = vsel %vm322_vm3, %v1057_v40, %v1045_v11 }
 0x86a   :  { %939 = vadd.xlane.f32.xlu0 %v938_v55 }
 0x880   :  { %1034 = vrot.lane.b32.xlu0 %v3858_v60, %s4277_s12  ;;  %v1064_v60 = vld [vmem:[%s4307_s7 + $0x8] sm:$0xff]  ;;  %s4309_s7 = sld [smem:[#allocation15_spill]]  ;;  %s4310_s12 = sld [smem:[#allocation13_spill]] }
 0x881   :  { %v3248_v3 = vpack.c.bf16 %v1064_v60, %v1063_v1 }
 0x883   :  { %3249 = vmatprep.subr.bf16.mxu0 %v3248_v3 }
 0x886   :  { %v1202_v36 = vld [vmem:[%s4309_s7 + $0x8] sm:$0xff]  ;;  %v1203_v39 = vld [vmem:[%s4309_s7 + $0x10] sm:$0xff]  ;;  %v1204_v42 = vld [vmem:[%s4309_s7 + $0x18] sm:$0xff] }
 0x887   :  { %v3260_v43 = vpack.c.bf16 %v1204_v42, %v1203_v39  ;;  %v2814_v51 = vld [vmem:[%s4310_s12] ss:$0 sm:$0xff]  ;;  %s4318_s12 = smov 104  }
 0x8f3   :  { %v937_v56 = vpop.xlane.xlu0 %936 }
 0x8f4   :  { %3488 = vrcp.f32 %v937_v56 }
 0x8f7   :  { %v940_v59 = vpop.xlane.xlu0 %939 }
 0x8f8   :  { %3490 = vrcp.f32 %v940_v59 }
 0x8fb   :  { %v1035_v10 = vpop.permute.xlu0 %1034 }
 0x8fc   :  { %v1056_v12 = vsel %vm238_vm1, %v3854_v58, %v1035_v10  ;;  %v2811_v58 = vld [vmem:[%s4308_s6] ss:$0 sm:$0xff]  ;;  %s4312_s6 = sld [smem:[#allocation17_spill]] }
 0x8fd   :  { %v1058_v14 = vsel %vm322_vm3, %v1056_v12, %v1043_v9  ;;  %v2816_v12 = vld [vmem:[%s4313_s9] ss:$0 sm:$0xff] }
 0x8fe   :  { %v3489_v61 = vpop.eup %3488 }
 0x8ff   :  { %v943_v62 = vmul.f32 %v3489_v61, %v3485_v50 }
 0x901   :  { %3048 = vmatprep.mubr.msk.f32.mxu0 %vm322_vm3, %v943_v62 }
 0x902   :  { %v3491_v63 = vpop.eup %3490  ;;  %v1311_v1 = vld [vmem:[%s4312_s6] sm:$0xff]  ;;  %v1312_v60 = vld [vmem:[%s4312_s6 + $0x8] sm:$0xff]  ;;  %v1314_v4 = vld [vmem:[%s4312_s6 + $0x18] sm:$0xff] }
 0x903   :  { %v944_v0 = vmul.f32 %v3491_v63, %v3487_v52  ;;  %v3264_v2 = vpack.c.bf16 %v1312_v60, %v1311_v1  ;;  %v1317_v9 = vld [vmem:[%s4312_s6 + $0x30] sm:$0xff]  ;;  %v1318_v10 = vld [vmem:[%s4312_s6 + $0x38] sm:$0xff] }
 0x904   :  { %v3276_v11 = vpack.c.bf16 %v1318_v10, %v1317_v9  ;;  %v2823_v10 = vld [vmem:[%s4251_s15] ss:$0 sm:$0xff]  ;;  %s4314_s15 = smov 64  }
 0x905   :  { %3049 = vmatmul.mubr.msk.f32.vlgmr.msra.gmra.mrb[6].mxu0 %vm322_vm3, %v944_v0 }
 0x906   :  { %3251 = vmatpush3.bf16.msra.mxu0 %v3248_v3  ;;  %v1313_v3 = vld [vmem:[%s4312_s6 + $0x10] sm:$0xff] }
 0x907   :  { %3253 = vmatprep.subr.bf16.mxu0 %v3252_v5 }
 0x90a   :  { %3255 = vmatpush3.bf16.msra.mxu0 %v3252_v5  ;;  %v3268_v5 = vpack.c.bf16 %v1314_v4, %v1313_v3 }
 0x90b   :  { %3265 = vmatprep.subr.bf16.mxu0 %v3264_v2 }
 0x9d8   :  { %v3050_v6 = vpop.f32.mrb[6].mxu0 }
 0x9d9   :  { %1052 = vrot.lane.b32.xlu1 %v3050_v6, %s4283_s4  ;;  %v1023_v7 = vpop.f32.mrb[7].mxu0  ;;  %v1315_v6 = vld [vmem:[%s4312_s6 + $0x20] sm:$0xff] }
 0x9da   :  { %1050 = vrot.lane.b32.xlu0 %v1023_v7, %s4283_s4  ;;  %v1316_v7 = vld [vmem:[%s4312_s6 + $0x28] sm:$0xff]  ;;  %s4321_s4 = smov 8  }
 0x9db   :  { %v3272_v8 = vpack.c.bf16 %v1316_v7, %v1315_v6  ;;  %v2822_v6 = vld [vmem:[%s4250_s14] ss:$0 sm:$0xff] }
 0xa4b   :  { %v1053_v13 = vpop.permute.xlu1 %1052 }
 0xa4c   :  { %v1051_v38 = vpop.permute.xlu0 %1050  ;;  %v1062_v17 = vsel %vm1060_vm4, %v1059_v15, %v1053_v13 }
 0xa4d   :  { %v1061_v16 = vsel %vm1060_vm4, %v1058_v14, %v1051_v38 }
 0xa4e   :  { %3059 = vmatprep.mubr.msk.f32.mxu0 %vm94_vm0, %v1061_v16 }
 0xa4f   :  { %3060 = vmatmul.mubr.msk.f32.vlgmr.msra.gmra.mrb[8].mxu0 %vm94_vm0, %v1062_v17 }
 0xa50   :  { %3267 = vmatpush3.bf16.msra.mxu0 %v3264_v2 }
 0xa51   :  { %3269 = vmatprep.subr.bf16.mxu0 %v3268_v5 }
 0xa54   :  { %3271 = vmatpush3.bf16.msra.mxu0 %v3268_v5 }
 0xa55   :  { %3273 = vmatprep.subr.bf16.mxu0 %v3272_v8 }
 0xa58   :  { %3275 = vmatpush3.bf16.msra.mxu0 %v3272_v8 }
 0xa59   :  { %3277 = vmatprep.subr.bf16.mxu0 %v3276_v11 }
 0xa5c   :  { %3279 = vmatpush3.bf16.msra.mxu0 %v3276_v11 }
 0xb22   :  { %v3061_v18 = vpop.f32.mrb[8].mxu0 }
 0xb23   :  { %v1152_v19 = vadd.f32 %v3061_v18, %v2811_v58  ;;  %v1146_v57 = vpop.f32.mrb[9].mxu0 }
 0xb24   :  { %v1147_v20 = vadd.f32 %v2811_v58, %v1146_v57 }
 0xb25   :  { %v1156_v21 = vadd.f32 %v1152_v19, %v3767_v35 }
 0xb26   :  { %v1155_v22 = vadd.f32 %v1147_v20, %v3763_v33  ;;  %v1201_v33 = vld [vmem:[%s4309_s7] sm:$0xff]  ;;  %s4311_s7 = sld [smem:[#allocation14_spill]] }
 0xb27   :  { %v1162_v23 = vsel %vm94_vm0, %v1156_v21, 0.0  ;;  %v3256_v37 = vpack.c.bf16 %v1202_v36, %v1201_v33 }
 0xb28   :  { %1163 = vadd.xlane.f32.xlu1 %v1162_v23  ;;  %v1159_v24 = vsel %vm94_vm0, %v1155_v22, 0.0 }
 0xb29   :  { %1160 = vadd.xlane.f32.xlu0 %v1159_v24  ;;  %3257 = vmatprep.subr.bf16.mxu1 %v3256_v37 }
 0xb2a   :  { %3259 = vmatpush3.bf16.msra.mxu1 %v3256_v37 }
 0xb2b   :  { %3261 = vmatprep.subr.bf16.mxu1 %v3260_v43 }
 0xb2c   :  { %v2815_v55 = vld [vmem:[%s4311_s7] ss:$0 sm:$0xff]  ;;  %s4322_s7 = smov 16  }
 0xb2e   :  { %3263 = vmatpush3.bf16.msra.mxu1 %v3260_v43 }
 0xbb5   :  { %v1164_v25 = vpop.xlane.xlu1 %1163 }
 0xbb6   :  { %v1166_v26 = vmul.f32 0.03125, %v1164_v25  ;;  %v1161_v27 = vpop.xlane.xlu0 %1160 }
 0xbb7   :  { %v1165_v28 = vmul.f32 0.03125, %v1161_v27 }
 0xbb8   :  { %v1168_v29 = vsub.f32 %v1156_v21, %v1166_v26 }
 0xbb9   :  { %v1167_v30 = vsub.f32 %v1155_v22, %v1165_v28 }
 0xbba   :  { %v1170_v34 = vmul.f32 %v1168_v29, %v1168_v29 }
 0xbbb   :  { %v1169_v31 = vmul.f32 %v1167_v30, %v1167_v30 }
 0xbbc   :  { %v1174_v35 = vsel %vm94_vm0, %v1170_v34, 0.0 }
 0xbbd   :  { %v1171_v32 = vsel %vm94_vm0, %v1169_v31, 0.0  ;;  %v2819_v31 = vld [vmem:[%s4249_s13] ss:$0 sm:$0xff] }
 0xbbe   :  { %1172 = vadd.xlane.f32.xlu0 %v1171_v32 }
 0xbc2   :  { %1175 = vadd.xlane.f32.xlu0 %v1174_v35 }
 0xc4b   :  { %v1173_v44 = vpop.xlane.xlu0 %1172 }
 0xc4c   :  { %v1177_v45 = vmul.f32 0.03125, %v1173_v44 }
 0xc4e   :  { %v1179_v46 = vadd.f32 1e-12, %v1177_v45 }
 0xc4f   :  { %v1176_v47 = vpop.xlane.xlu0 %1175 }
 0xc50   :  { %3492 = vrsqrt.f32 %v1179_v46  ;;  %v1178_v49 = vmul.f32 0.03125, %v1176_v47 }
 0xc52   :  { %v1180_v41 = vadd.f32 1e-12, %v1178_v49 }
 0xc54   :  { %3494 = vrsqrt.f32 %v1180_v41 }
 0xc5a   :  { %v3493_v50 = vpop.eup %3492 }
 0xc5b   :  { %v1183_v52 = vmul.f32 %v3493_v50, %v1167_v30 }
 0xc5d   :  { %v1191_v56 = vmul.f32 %v2814_v51, %v1183_v52 }
 0xc5e   :  { %v3495_v59 = vpop.eup %3494 }
 0xc5f   :  { %v1184_v61 = vmul.f32 %v3495_v59, %v1168_v29  ;;  %v1199_v62 = vadd.f32 %v2815_v55, %v1191_v56  ;;  %v1455_v56 = vld [vmem:[%s4252_s16 + $0x8] sm:$0xff] }
 0xc61   :  { %v1192_v63 = vmul.f32 %v2814_v51, %v1184_v61  ;;  %3070 = vmatprep.mubr.msk.f32.mxu1 %vm94_vm0, %v1199_v62  ;;  %v1456_v61 = vld [vmem:[%s4252_s16 + $0x10] sm:$0xff] }
 0xc63   :  { %v1200_v0 = vadd.f32 %v2815_v55, %v1192_v63  ;;  %v1454_v55 = vld [vmem:[%s4252_s16] sm:$0xff] }
 0xc64   :  { %v3280_v59 = vpack.c.bf16 %v1455_v56, %v1454_v55 }
 0xc65   :  { %3071 = vmatmul.mubr.msk.f32.vlgmr.msra.gmra.mrb[10].mxu1 %vm94_vm0, %v1200_v0 }
 0xc66   :  { %3281 = vmatprep.subr.bf16.mxu1 %v3280_v59 }
 0xc67   :  { %3283 = vmatpush3.bf16.msra.mxu1 %v3280_v59 }
 0xd38   :  { %v3072_v13 = vpop.f32.mrb[10].mxu1 }
 0xd39   :  { %v1290_v40 = vadd.f32 %v3072_v13, %v2816_v12  ;;  %v1284_v14 = vpop.f32.mrb[11].mxu1 }
 0xd3a   :  { %v1285_v38 = vadd.f32 %v2816_v12, %v1284_v14  ;;  %v2824_v14 = vld [vmem:[%s4253_s17] ss:$0 sm:$0xff]  ;;  %s4315_s17 = smov 80  }
 0xd3b   :  { %v1294_v15 = vmul.f32 %v1290_v40, %v1290_v40 }
 0xd3c   :  { %v1293_v16 = vmul.f32 %v1285_v38, %v1285_v38 }
 0xd3d   :  { %v1296_v17 = vmul.f32 %v1294_v15, %v1290_v40 }
 0xd3e   :  { %v1295_v58 = vmul.f32 %v1293_v16, %v1285_v38 }
 0xd3f   :  { %v1298_v18 = vmul.f32 0.044715, %v1296_v17 }
 0xd40   :  { %v1297_v19 = vmul.f32 0.044715, %v1295_v58 }
 0xd41   :  { %v1300_v57 = vadd.f32 %v1298_v18, %v1290_v40 }
 0xd42   :  { %v1299_v20 = vadd.f32 %v1297_v19, %v1285_v38 }
 0xd43   :  { %v1302_v21 = vmul.f32 0.7978846, %v1300_v57 }
 0xd44   :  { %v1301_v22 = vmul.f32 0.7978846, %v1299_v20 }
 0xd45   :  { %3496 = vtanh.f32 %v1302_v21 }
 0xd46   :  { %3498 = vtanh.f32 %v1301_v22 }
 0xd4f   :  { %v3497_v23 = vpop.eup %3496 }
 0xd50   :  { %v3499_v24 = vpop.eup %3498  ;;  %v1306_v25 = vadd.f32 1.0, %v3497_v23 }
 0xd51   :  { %v1305_v26 = vadd.f32 1.0, %v3499_v24 }
 0xd52   :  { %v1308_v27 = vmul.f32 0.5, %v1306_v25 }
 0xd53   :  { %v1307_v28 = vmul.f32 0.5, %v1305_v26 }
 0xd54   :  { %v1310_v30 = vmul.f32 %v1308_v27, %v1290_v40 }
 0xd55   :  { %v1309_v29 = vmul.f32 %v1307_v28, %v1285_v38 }
 0xd57   :  { %3089 = vmatprep.mubr.msk.f32.mxu0 %vm1326_vm5, %v1309_v29 }
 0xd58   :  { %3090 = vmatmul.mubr.msk.f32.vlgmr.msra.gmra.mrb[10].mxu0 %vm1326_vm5, %v1310_v30 }
 0xe2b   :  { %v3091_v32 = vpop.f32.mrb[10].mxu0 }
 0xe2c   :  { %v1405_v34 = vadd.f32 %v3091_v32, %v2819_v31  ;;  %v1399_v35 = vpop.f32.mrb[11].mxu0 }
 0xe2d   :  { %v1400_v33 = vadd.f32 %v2819_v31, %v1399_v35 }
 0xe2e   :  { %v1409_v36 = vadd.f32 %v1405_v34, %v1200_v0 }
 0xe2f   :  { %v1408_v37 = vadd.f32 %v1400_v33, %v1199_v62  ;;  %v1457_v62 = vld [vmem:[%s4252_s16 + $0x18] sm:$0xff] }
 0xe30   :  { %v1415_v39 = vsel %vm94_vm0, %v1409_v36, 0.0  ;;  %v3284_v63 = vpack.c.bf16 %v1457_v62, %v1456_v61 }
 0xe31   :  { %1416 = vadd.xlane.f32.xlu1 %v1415_v39  ;;  %v1412_v42 = vsel %vm94_vm0, %v1408_v37, 0.0 }
 0xe32   :  { %1413 = vadd.xlane.f32.xlu0 %v1412_v42  ;;  %3285 = vmatprep.subr.bf16.mxu1 %v3284_v63 }
 0xe33   :  { %3287 = vmatpush3.bf16.msra.mxu1 %v3284_v63 }
 0xebe   :  { %v1417_v43 = vpop.xlane.xlu1 %1416 }
 0xebf   :  { %v1419_v44 = vmul.f32 0.03125, %v1417_v43  ;;  %v1414_v45 = vpop.xlane.xlu0 %1413 }
 0xec0   :  { %v1418_v46 = vmul.f32 0.03125, %v1414_v45 }
 0xec1   :  { %v1421_v47 = vsub.f32 %v1409_v36, %v1419_v44 }
 0xec2   :  { %v1420_v49 = vsub.f32 %v1408_v37, %v1418_v46 }
 0xec3   :  { %v1423_v41 = vmul.f32 %v1421_v47, %v1421_v47 }
 0xec4   :  { %v1422_v50 = vmul.f32 %v1420_v49, %v1420_v49 }
 0xec5   :  { %v1427_v51 = vsel %vm94_vm0, %v1423_v41, 0.0 }
 0xec6   :  { %1428 = vadd.xlane.f32.xlu1 %v1427_v51  ;;  %v1424_v52 = vsel %vm94_vm0, %v1422_v50, 0.0 }
 0xec7   :  { %1425 = vadd.xlane.f32.xlu0 %v1424_v52 }
 0xf53   :  { %v1429_v0 = vpop.xlane.xlu1 %1428 }
 0xf54   :  { %v1431_v1 = vmul.f32 0.03125, %v1429_v0  ;;  %v1426_v60 = vpop.xlane.xlu0 %1425 }
 0xf55   :  { %v1430_v2 = vmul.f32 0.03125, %v1426_v60 }
 0xf56   :  { %v1433_v3 = vadd.f32 1e-12, %v1431_v1 }
 0xf57   :  { %v1432_v4 = vadd.f32 1e-12, %v1430_v2 }
 0xf58   :  { %3500 = vrsqrt.f32 %v1433_v3 }
 0xf59   :  { %3502 = vrsqrt.f32 %v1432_v4 }
 0xf62   :  { %v3501_v5 = vpop.eup %3500 }
 0xf63   :  { %v3503_v7 = vpop.eup %3502  ;;  %v1437_v8 = vmul.f32 %v3501_v5, %v1421_v47 }
 0xf64   :  { %v1436_v9 = vmul.f32 %v3503_v7, %v1420_v49 }
 0xf65   :  { %v1445_v11 = vmul.f32 %v2822_v6, %v1437_v8 }
 0xf66   :  { %v1444_v12 = vmul.f32 %v2822_v6, %v1436_v9 }
 0xf67   :  { %v4007_v40 = vadd.f32 %v2823_v10, %v1445_v11 }
 0xf68   :  { %v4005_v13 = vadd.f32 %v2823_v10, %v1444_v12 }
 0xf6a   :  { %3100 = vmatprep.mubr.msk.f32.mxu1 %vm94_vm0, %v4005_v13 }
 0xf6b   :  { %3101 = vmatmul.mubr.msk.f32.vlgmr.msra.gmra.mrb[12].mxu1 %vm94_vm0, %v4007_v40 }
0x103e   :  { %v3102_v38 = vpop.f32.mrb[12].mxu1 }
0x103f   :  { %v4016_v15 = vadd.f32 %v3102_v38, %v2824_v14  ;;  %v1537_v16 = vpop.f32.mrb[13].mxu1 }
0x1040   :  { %v4018_v17 = vadd.f32 %v2824_v14, %v1537_v16 }
0x1042   :  { %3107 = vmatprep.mubr.msk.f32.mxu1 %vm238_vm1, %v4018_v17  ;;  %v4024_v58 = vpack.i.bf16 %v4016_v15, %v4018_v17 }
0x1044   :  { %3422 = vrot.lane.b32.xlu1 %v4024_v58, %s3574_s11  ;;  %3417 = vrot.lane.b32.xlu0 %v4024_v58, %s3575_s29  ;;  %s4316_s11 = smov 112  }
0x1048   :  { %1744 = vrot.lane.b32.xlu1 %v4018_v17, %s3576_s2 }
0x104c   :  { %1746 = vrot.lane.b32.xlu1 %v4016_v15, %s3576_s2 }
0x10b6   :  { %v3423_v18 = vpop.permute.xlu1 %3422  ;;  %v3418_v19 = vpop.permute.xlu0 %3417 }
0x10b7   :  { %v3425_v57 = vunpack.i.h.bf16 %v3423_v18  ;;  %v3424_v20 = vunpack.i.l.bf16 %v3423_v18  ;;  %v3420_v21 = vunpack.i.h.bf16 %v3418_v19  ;;  %v3419_v22 = vunpack.i.l.bf16 %v3418_v19 }
0x10b9   :  { %v3288_v23 = vpack.c.bf16 %v3420_v21, %v3419_v22  ;;  %v3298_v24 = vpack.c.bf16 %v3425_v57, %v3424_v20 }
0x10ba   :  { %v1745_v25 = vpop.permute.xlu1 %1744 }
0x10bb   :  { %3290 = vmatprep.subr.msk.bf16.mxu1 %vm3794_vm2, %v3288_v23 }
0x10bc   :  { %3293 = vmatpush3.bf16.xpose.msk.msra.mxu1 %vm3794_vm2, %v3288_v23 }
0x10bd   :  { %3300 = vmatprep.subr.msk.bf16.mxu1 %vm3794_vm2, %v3298_v24 }
0x10be   :  { %v1747_v26 = vpop.permute.xlu1 %1746 }
0x10c3   :  { %3108 = vmatmul.mubr.msk.f32.vlgmr.msra.gmra.mrb[14].mxu1 %vm238_vm1, %v4016_v15 }
0x10c4   :  { %3303 = vmatpush3.bf16.xpose.msk.msra.mxu1 %vm3794_vm2, %v3298_v24  ;;  %3121 = vmatprep.mubr.msk.f32.mxu1 %vm238_vm1, %v1745_v25 }
0x10cb   :  { %3122 = vmatmul.mubr.msk.f32.vlgmr.msra.gmra.mrb[16].mxu1 %vm238_vm1, %v1747_v26 }
0x1196   :  { %v3109_v27 = vpop.f32.mrb[14].mxu1 }
0x1197   :  { %v1632_v28 = vadd.f32 %v3109_v27, %v3813_v53  ;;  %v1626_v29 = vpop.f32.mrb[15].mxu1 }
0x1198   :  { %v1627_v30 = vadd.f32 %v1626_v29, %v3818_v54 }
0x1199   :  { %v1638_v31 = vsel %vm322_vm3, %v1632_v28, -inf }
0x119a   :  { %1639 = vmax.xlane.f32.xlu1 %v1638_v31  ;;  %v1635_v32 = vsel %vm322_vm3, %v1627_v30, -inf }
0x119b   :  { %1636 = vmax.xlane.f32.xlu0 %v1635_v32  ;;  %v3548_v32 = vld [vmem:[%s4306_s1 + $0x8] sm:$0xff] }
0x119e   :  { %v3123_v34 = vpop.f32.mrb[16].mxu1 }
0x119f   :  { %v1826_v35 = vpop.f32.mrb[17].mxu1  ;;  %v1832_v36 = vadd.f32 %v3123_v34, %v3813_v53 }
0x11a0   :  { %v1827_v33 = vadd.f32 %v1826_v35, %v3818_v54 }
0x11a1   :  { %v1838_v39 = vsel %vm322_vm3, %v1832_v36, -inf }
0x11a2   :  { %v1835_v37 = vsel %vm322_vm3, %v1827_v33, -inf }
0x11a3   :  { %1836 = vmax.xlane.f32.xlu0 %v1835_v37 }
0x11a7   :  { %1839 = vmax.xlane.f32.xlu0 %v1838_v39 }
0x1227   :  { %v1640_v42 = vpop.xlane.xlu1 %1639 }
0x1228   :  { %v1642_v43 = vsub.f32 %v1632_v28, %v1640_v42  ;;  %v1637_v44 = vpop.xlane.xlu0 %1636 }
0x1229   :  { %v1641_v45 = vsub.f32 %v1627_v30, %v1637_v44 }
0x122a   :  { %v1645_v46 = vmul.f32 1.442695, %v1642_v43 }
0x122b   :  { %v1643_v47 = vmul.f32 1.442695, %v1641_v45 }
0x122c   :  { %3504 = vpow2.f32 %v1645_v46 }
0x122d   :  { %3506 = vpow2.f32 %v1643_v47 }
0x1230   :  { %v1837_v49 = vpop.xlane.xlu0 %1836 }
0x1231   :  { %v1841_v41 = vsub.f32 %v1827_v33, %v1837_v49  ;;  %v3549_v33 = vld [vmem:[%s4306_s1] sm:$0xff]  ;;  %s4319_s1 = smov 72  }
0x1233   :  { %v1843_v50 = vmul.f32 1.442695, %v1841_v41 }
0x1234   :  { %v1840_v54 = vpop.xlane.xlu0 %1839 }
0x1235   :  { %3508 = vpow2.f32 %v1843_v50  ;;  %v1842_v53 = vsub.f32 %v1832_v36, %v1840_v54 }
0x1236   :  { %v3505_v51 = vpop.eup %3504 }
0x1237   :  { %v3507_v52 = vpop.eup %3506  ;;  %v1845_v55 = vmul.f32 1.442695, %v1842_v53  ;;  %v1650_v56 = vsel %vm322_vm3, %v3505_v51, 0.0 }
0x1238   :  { %1651 = vadd.xlane.f32.xlu1 %v1650_v56  ;;  %v1647_v59 = vsel %vm322_vm3, %v3507_v52, 0.0 }
0x1239   :  { %3510 = vpow2.f32 %v1845_v55  ;;  %1648 = vadd.xlane.f32.xlu0 %v1647_v59 }
0x123f   :  { %v3509_v61 = vpop.eup %3508 }
0x1240   :  { %v1847_v62 = vsel %vm322_vm3, %v3509_v61, 0.0 }
0x1241   :  { %1848 = vadd.xlane.f32.xlu0 %v1847_v62 }
0x1243   :  { %v3511_v63 = vpop.eup %3510 }
0x1244   :  { %v1850_v0 = vsel %vm322_vm3, %v3511_v63, 0.0 }
0x1245   :  { %1851 = vadd.xlane.f32.xlu1 %v1850_v0 }
0x1256   :  { %3432 = vrot.lane.b32.xlu1 %v4024_v58, %s3577_s5 }
0x1257   :  { %3427 = vrot.lane.b32.xlu0 %v4024_v58, %s4314_s15 }
0x125a   :  { %3437 = vrot.lane.b32.xlu1 %v4024_v58, %s4315_s17  ;;  %s4323_s17 = smov 24  }
0x125b   :  { %1946 = vrot.lane.b32.xlu0 %v4016_v15, %s4316_s11 }
0x125e   :  { %1944 = vrot.lane.b32.xlu1 %v4018_v17, %s4316_s11 }
0x12c5   :  { %v1652_v60 = vpop.xlane.xlu1 %1651 }
0x12c6   :  { %v1649_v1 = vpop.xlane.xlu0 %1648 }
0x12c7   :  { %3512 = vrcp.f32 %v1649_v1 }
0x12c8   :  { %3514 = vrcp.f32 %v1652_v60 }
0x12ce   :  { %v1849_v2 = vpop.xlane.xlu0 %1848 }
0x12cf   :  { %3516 = vrcp.f32 %v1849_v2 }
0x12d1   :  { %v3513_v3 = vpop.eup %3512 }
0x12d2   :  { %v1852_v4 = vpop.xlane.xlu1 %1851  ;;  %v3428_v5 = vpop.permute.xlu0 %3427  ;;  %v1655_v6 = vmul.f32 %v3513_v3, %v3507_v52 }
0x12d3   :  { %3518 = vrcp.f32 %v1852_v4  ;;  %v3430_v7 = vunpack.i.h.bf16 %v3428_v5  ;;  %v3429_v8 = vunpack.i.l.bf16 %v3428_v5  ;;  %v3515_v10 = vpop.eup %3514 }
0x12d4   :  { %3114 = vmatprep.mubr.msk.f32.mxu0 %vm322_vm3, %v1655_v6  ;;  %v1656_v16 = vmul.f32 %v3515_v10, %v3505_v51 }
0x12d5   :  { %v3294_v9 = vpack.c.bf16 %v3430_v7, %v3429_v8 }
0x12d6   :  { %v3433_v11 = vpop.permute.xlu1 %3432  ;;  %v1947_v26 = vpop.permute.xlu0 %1946 }
0x12d7   :  { %v3435_v12 = vunpack.i.h.bf16 %v3433_v11  ;;  %v3434_v14 = vunpack.i.l.bf16 %v3433_v11  ;;  %3295 = vmatprep.subr.bf16.mxu0 %v3294_v9 }
0x12d8   :  { %3297 = vmatpush3.bf16.msra.mxu0 %v3294_v9 }
0x12d9   :  { %v3517_v38 = vpop.eup %3516  ;;  %v3304_v18 = vpack.c.bf16 %v3435_v12, %v3434_v14 }
0x12da   :  { %v3438_v19 = vpop.permute.xlu1 %3437  ;;  %v1855_v57 = vmul.f32 %v3517_v38, %v3509_v61 }
0x12db   :  { %v3440_v20 = vunpack.i.h.bf16 %v3438_v19  ;;  %v3439_v21 = vunpack.i.l.bf16 %v3438_v19  ;;  %3115 = vmatmul.mubr.msk.f32.vlgmr.msra.gmra.mrb[12].mxu0 %vm322_vm3, %v1656_v16  ;;  %3305 = vmatprep.subr.bf16.mxu0 %v3304_v18 }
0x12dc   :  { %3307 = vmatpush3.bf16.msra.mxu0 %v3304_v18  ;;  %3128 = vmatprep.mubr.msk.f32.mxu0 %vm322_vm3, %v1855_v57 }
0x12dd   :  { %v3519_v22 = vpop.eup %3518  ;;  %v3308_v23 = vpack.c.bf16 %v3440_v20, %v3439_v21 }
0x12de   :  { %v1856_v24 = vmul.f32 %v3519_v22, %v3511_v63  ;;  %v1945_v25 = vpop.permute.xlu1 %1944 }
0x12df   :  { %3310 = vmatprep.subr.msk.bf16.mxu0 %vm3794_vm2, %v3308_v23 }
0x12e0   :  { %3129 = vmatmul.mubr.msk.f32.vlgmr.msra.gmra.mrb[14].mxu0 %vm322_vm3, %v1856_v24 }
0x12e1   :  { %3135 = vmatprep.mubr.msk.f32.mxu0 %vm238_vm1, %v1945_v25 }
0x12e5   :  { %3313 = vmatpush3.bf16.xpose.msk.msra.mxu0 %vm3794_vm2, %v3308_v23 }
0x12ec   :  { %3136 = vmatmul.mubr.msk.f32.vlgmr.msra.gmra.mrb[16].mxu0 %vm238_vm1, %v1947_v26 }
0x13ae   :  { %v4078_v27 = vpop.f32.mrb[12].mxu0 }
0x13af   :  { %v4080_v28 = vpop.f32.mrb[13].mxu0 }
0x13b3   :  { %v4082_v29 = vpop.f32.mrb[14].mxu0 }
0x13b4   :  { %v4084_v30 = vpop.f32.mrb[15].mxu0 }
0x13bf   :  { %v3137_v31 = vpop.f32.mrb[16].mxu0 }
0x13c0   :  { %v2032_v34 = vadd.f32 %v3548_v32, %v3137_v31  ;;  %v2026_v35 = vpop.f32.mrb[17].mxu0 }
0x13c1   :  { %v2027_v36 = vadd.f32 %v3549_v33, %v2026_v35  ;;  %v2374_v35 = vld [vmem:[%s4254_s18] sm:$0xff] }
0x13c2   :  { %v2038_v37 = vsel %vm322_vm3, %v2032_v34, -inf }
0x13c3   :  { %2039 = vmax.xlane.f32.xlu0 %v2038_v37  ;;  %v2035_v39 = vsel %vm322_vm3, %v2027_v36, -inf  ;;  %v2377_v37 = vld [vmem:[%s4254_s18 + $0x18] sm:$0xff] }
0x13c4   :  { %2036 = vmax.xlane.f32.xlu1 %v2035_v39 }
0x13d5   :  { %3442 = vrot.lane.b32.xlu1 %v4024_v58, %s4317_s0 }
0x13d9   :  { %2144 = vrot.lane.b32.xlu1 %v4018_v17, %s4318_s12 }
0x13dd   :  { %2146 = vrot.lane.b32.xlu1 %v4016_v15, %s4318_s12 }
0x1450   :  { %v2040_v42 = vpop.xlane.xlu0 %2039 }
0x1451   :  { %v2042_v43 = vsub.f32 %v2032_v34, %v2040_v42  ;;  %v2037_v44 = vpop.xlane.xlu1 %2036 }
0x1452   :  { %v2041_v45 = vsub.f32 %v2027_v36, %v2037_v44 }
0x1453   :  { %v2045_v46 = vmul.f32 1.442695, %v2042_v43 }
0x1454   :  { %v2043_v47 = vmul.f32 1.442695, %v2041_v45 }
0x1455   :  { %3520 = vpow2.f32 %v2045_v46  ;;  %v3443_v49 = vpop.permute.xlu1 %3442 }
0x1456   :  { %v3445_v41 = vunpack.i.h.bf16 %v3443_v49  ;;  %v3444_v50 = vunpack.i.l.bf16 %v3443_v49  ;;  %3522 = vpow2.f32 %v2043_v47 }
0x1458   :  { %v3314_v54 = vpack.c.bf16 %v3445_v41, %v3444_v50 }
0x1459   :  { %v2145_v2 = vpop.permute.xlu1 %2144 }
0x145a   :  { %3315 = vmatprep.subr.bf16.mxu1 %v3314_v54 }
0x145b   :  { %3317 = vmatpush3.bf16.msra.mxu1 %v3314_v54 }
0x145d   :  { %v2147_v3 = vpop.permute.xlu1 %2146 }
0x145f   :  { %v3521_v53 = vpop.eup %3520 }
0x1460   :  { %v2050_v17 = vsel %vm322_vm3, %v3521_v53, 0.0  ;;  %v3523_v51 = vpop.eup %3522 }
0x1461   :  { %2051 = vadd.xlane.f32.xlu0 %v2050_v17  ;;  %v2047_v15 = vsel %vm322_vm3, %v3523_v51, 0.0 }
0x1465   :  { %2048 = vadd.xlane.f32.xlu0 %v2047_v15 }
0x147b   :  { %3447 = vrot.lane.b32.xlu0 %v4024_v58, %s4319_s1 }
0x14ee   :  { %v2052_v52 = vpop.xlane.xlu0 %2051 }
0x14ef   :  { %3524 = vrcp.f32 %v2052_v52 }
0x14f2   :  { %v2049_v55 = vpop.xlane.xlu0 %2048 }
0x14f3   :  { %3526 = vrcp.f32 %v2049_v55 }
0x14f6   :  { %v3448_v56 = vpop.permute.xlu0 %3447 }
0x14f7   :  { %v3450_v59 = vunpack.i.h.bf16 %v3448_v56  ;;  %v3449_v61 = vunpack.i.l.bf16 %v3448_v56 }
0x14f9   :  { %v3318_v62 = vpack.c.bf16 %v3450_v59, %v3449_v61  ;;  %v3525_v63 = vpop.eup %3524 }
0x14fa   :  { %v2056_v60 = vmul.f32 %v3525_v63, %v3521_v53 }
0x14fb   :  { %3320 = vmatprep.subr.msk.bf16.mxu1 %vm3794_vm2, %v3318_v62 }
0x14fd   :  { %v3527_v0 = vpop.eup %3526 }
0x14fe   :  { %v2055_v1 = vmul.f32 %v3527_v0, %v3523_v51 }
0x1500   :  { %3142 = vmatprep.mubr.msk.f32.mxu1 %vm322_vm3, %v2055_v1 }
0x1501   :  { %3143 = vmatmul.mubr.msk.f32.vlgmr.msra.gmra.mrb[18].mxu1 %vm322_vm3, %v2056_v60 }
0x1502   :  { %3323 = vmatpush3.bf16.xpose.msk.msra.mxu1 %vm3794_vm2, %v3318_v62  ;;  %3149 = vmatprep.mubr.msk.f32.mxu1 %vm238_vm1, %v2145_v2 }
0x1509   :  { %3150 = vmatmul.mubr.msk.f32.vlgmr.msra.gmra.mrb[20].mxu1 %vm238_vm1, %v2147_v3 }
0x15d4   :  { %v3144_v4 = vpop.f32.mrb[18].mxu1 }
0x15d5   :  { %v2135_v5 = vpop.f32.mrb[19].mxu1 }
0x15dc   :  { %v3151_v6 = vpop.f32.mrb[20].mxu1 }
0x15dd   :  { %v2232_v7 = vadd.f32 %v3548_v32, %v3151_v6  ;;  %v2226_v8 = vpop.f32.mrb[21].mxu1 }
0x15de   :  { %v2227_v9 = vadd.f32 %v3549_v33, %v2226_v8  ;;  %v2376_v33 = vld [vmem:[%s4254_s18 + $0x10] sm:$0xff]  ;;  %v2513_v8 = vld [vmem:[%s4258_s22 + $0x8] sm:$0xff] }
0x15df   :  { %v2238_v10 = vsel %vm322_vm3, %v2232_v7, -inf  ;;  %v3332_v39 = vpack.c.bf16 %v2377_v37, %v2376_v33  ;;  %v2627_v37 = vld [vmem:[%s4260_s24 + $0x28] sm:$0xff] }
0x15e0   :  { %2239 = vmax.xlane.f32.xlu0 %v2238_v10  ;;  %v2235_v11 = vsel %vm322_vm3, %v2227_v9, -inf  ;;  %v2514_v10 = vld [vmem:[%s4258_s22 + $0x10] sm:$0xff] }
0x15e1   :  { %2236 = vmax.xlane.f32.xlu1 %v2235_v11  ;;  %v2515_v11 = vld [vmem:[%s4258_s22 + $0x18] sm:$0xff] }
0x15f2   :  { %3452 = vrot.lane.b32.xlu1 %v4024_v58, %s4320_s8 }
0x15f6   :  { %2348 = vrot.lane.b32.xlu1 %v4082_v29, %s4321_s4 }
0x15fa   :  { %2354 = vrot.lane.b32.xlu1 %v2135_v5, %s4322_s7 }
0x15fe   :  { %2356 = vrot.lane.b32.xlu1 %v3144_v4, %s4322_s7  ;;  %s3588_s7 = smov [#allocation2]  }
0x15ff   :  { %s2771_s30 = sshll.u32 %s3588_s7, 4  ;;  %s2772_s30 = int_to_ptr.vmem [resolvable:$true] %s2771_s30 }
0x1600   :  { %s3550_s3 = scalar_lea.vmem %s2772_s30, 256  ;;  %p3555_p1 = scmp.lt.s32.totalorder %s2772_s30, %s2772_s30 }
0x1601   :  { %p3551_p0 = scmp.ne.s32.totalorder %s2772_s30, %s3550_s3  ;;  %p3556_p2 = scmp.lt.s32.totalorder %s3550_s3, %s3550_s3 }
0x1603   :  { %p3557_p3 = por %p3556_p2, %p3555_p1 }
0x1605   :  { %p3558_p4 = pnand %p3557_p3, %p3551_p0 }
0x166d   :  { %v2240_v48 = vpop.xlane.xlu0 %2239 }
0x166e   :  { %v2242_v12 = vsub.f32 %v2232_v7, %v2240_v48  ;;  %v2237_v14 = vpop.xlane.xlu1 %2236  ;;  %v3340_v48 = vpack.c.bf16 %v2515_v11, %v2514_v10 }
0x166f   :  { %v2241_v38 = vsub.f32 %v2227_v9, %v2237_v14 }
0x1670   :  { %v2245_v16 = vmul.f32 1.442695, %v2242_v12 }
0x1671   :  { %v2243_v18 = vmul.f32 1.442695, %v2241_v38 }
0x1672   :  { %v3453_v19 = vpop.permute.xlu1 %3452 }
0x1673   :  { %3528 = vpow2.f32 %v2243_v18  ;;  %v3455_v57 = vunpack.i.h.bf16 %v3453_v19  ;;  %v3454_v20 = vunpack.i.l.bf16 %v3453_v19 }
0x1674   :  { %3530 = vpow2.f32 %v2245_v16 }
0x1675   :  { %v3324_v21 = vpack.c.bf16 %v3455_v57, %v3454_v20  ;;  %v2854_v20 = vld [vmem:[%s4256_s20] ss:$0 sm:$0xff] }
0x1676   :  { %v2349_v44 = vpop.permute.xlu1 %2348 }
0x1677   :  { %3325 = vmatprep.subr.bf16.mxu0 %v3324_v21  ;;  %v2369_v50 = vsel %vm238_vm1, %v4078_v27, %v2349_v44 }
0x1678   :  { %3327 = vmatpush3.bf16.msra.mxu0 %v3324_v21 }
0x167a   :  { %v2355_v45 = vpop.permute.xlu1 %2354 }
0x167d   :  { %v3529_v58 = vpop.eup %3528 }
0x167e   :  { %v2247_v22 = vsel %vm322_vm3, %v3529_v58, 0.0  ;;  %v3531_v23 = vpop.eup %3530  ;;  %v2357_v47 = vpop.permute.xlu1 %2356 }
0x167f   :  { %2248 = vadd.xlane.f32.xlu0 %v2247_v22  ;;  %v2250_v24 = vsel %vm322_vm3, %v3531_v23, 0.0  ;;  %v2371_v17 = vsel %vm322_vm3, %v2369_v50, %v2357_v47 }
0x1683   :  { %2251 = vadd.xlane.f32.xlu0 %v2250_v24 }
0x1699   :  { %2346 = vrot.lane.b32.xlu0 %v4084_v30, %s4321_s4  ;;  %v2375_v30 = vld [vmem:[%s4254_s18 + $0x8] sm:$0xff] }
0x169a   :  { %v3328_v36 = vpack.c.bf16 %v2375_v30, %v2374_v35  ;;  %v2624_v35 = vld [vmem:[%s4260_s24 + $0x10] sm:$0xff]  ;;  %v2625_v30 = vld [vmem:[%s4260_s24 + $0x18] sm:$0xff] }
0x169b   :  { %v3348_v33 = vpack.c.bf16 %v2625_v30, %v2624_v35 }
0x169c   :  { %3329 = vmatprep.subr.bf16.mxu0 %v3328_v36 }
0x170c   :  { %v2249_v25 = vpop.xlane.xlu0 %2248 }
0x170d   :  { %3532 = vrcp.f32 %v2249_v25 }
0x1710   :  { %v2252_v26 = vpop.xlane.xlu0 %2251 }
0x1711   :  { %3534 = vrcp.f32 %v2252_v26 }
0x1714   :  { %v2347_v46 = vpop.permute.xlu0 %2346 }
0x1715   :  { %v2368_v49 = vsel %vm238_vm1, %v4080_v28, %v2347_v46  ;;  %v2851_v28 = vld [vmem:[%s4255_s19] ss:$0 sm:$0xff] }
0x1716   :  { %v2370_v54 = vsel %vm322_vm3, %v2368_v49, %v2355_v45  ;;  %v2856_v45 = vld [vmem:[%s4259_s23] ss:$0 sm:$0xff] }
0x1717   :  { %v3533_v29 = vpop.eup %3532 }
0x1718   :  { %v2255_v31 = vmul.f32 %v3533_v29, %v3529_v58  ;;  %v2855_v58 = vld [vmem:[%s4257_s21] ss:$0 sm:$0xff] }
0x171a   :  { %3156 = vmatprep.mubr.msk.f32.mxu0 %vm322_vm3, %v2255_v31  ;;  %v2622_v31 = vld [vmem:[%s4260_s24] sm:$0xff] }
0x171b   :  { %v3535_v32 = vpop.eup %3534 }
0x171c   :  { %v2256_v34 = vmul.f32 %v3535_v32, %v3531_v23  ;;  %v2623_v32 = vld [vmem:[%s4260_s24 + $0x8] sm:$0xff] }
0x171e   :  { %3157 = vmatmul.mubr.msk.f32.vlgmr.msra.gmra.mrb[18].mxu0 %vm322_vm3, %v2256_v34  ;;  %v3344_v34 = vpack.c.bf16 %v2623_v32, %v2622_v31  ;;  %v2863_v32 = vld [vmem:[%s4263_s27] ss:$0 sm:$0xff] }
0x171f   :  { %3331 = vmatpush3.bf16.msra.mxu0 %v3328_v36  ;;  %v2626_v36 = vld [vmem:[%s4260_s24 + $0x20] sm:$0xff] }
0x1720   :  { %3333 = vmatprep.subr.bf16.mxu0 %v3332_v39 }
0x1723   :  { %3335 = vmatpush3.bf16.msra.mxu0 %v3332_v39  ;;  %v3352_v39 = vpack.c.bf16 %v2627_v37, %v2626_v36 }
0x1724   :  { %3345 = vmatprep.subr.bf16.mxu0 %v3344_v34 }
0x17f1   :  { %v3158_v42 = vpop.f32.mrb[18].mxu0 }
0x17f2   :  { %2364 = vrot.lane.b32.xlu1 %v3158_v42, %s4323_s17  ;;  %v2335_v43 = vpop.f32.mrb[19].mxu0  ;;  %v2628_v42 = vld [vmem:[%s4260_s24 + $0x30] sm:$0xff] }
0x17f3   :  { %2362 = vrot.lane.b32.xlu0 %v2335_v43, %s4323_s17  ;;  %v2629_v43 = vld [vmem:[%s4260_s24 + $0x38] sm:$0xff] }
0x17f4   :  { %v3356_v44 = vpack.c.bf16 %v2629_v43, %v2628_v42 }
0x1864   :  { %v2365_v41 = vpop.permute.xlu1 %2364 }
0x1865   :  { %v2363_v53 = vpop.permute.xlu0 %2362  ;;  %v2373_v15 = vsel %vm1060_vm4, %v2371_v17, %v2365_v41 }
0x1866   :  { %v2372_v51 = vsel %vm1060_vm4, %v2370_v54, %v2363_v53 }
0x1867   :  { %3167 = vmatprep.mubr.msk.f32.mxu0 %vm94_vm0, %v2372_v51 }
0x1868   :  { %3168 = vmatmul.mubr.msk.f32.vlgmr.msra.gmra.mrb[20].mxu0 %vm94_vm0, %v2373_v15 }
0x1869   :  { %3347 = vmatpush3.bf16.msra.mxu0 %v3344_v34 }
0x186a   :  { %3349 = vmatprep.subr.bf16.mxu0 %v3348_v33 }
0x186d   :  { %3351 = vmatpush3.bf16.msra.mxu0 %v3348_v33 }
0x186e   :  { %3353 = vmatprep.subr.bf16.mxu0 %v3352_v39 }
0x1871   :  { %3355 = vmatpush3.bf16.msra.mxu0 %v3352_v39 }
0x1872   :  { %3357 = vmatprep.subr.bf16.mxu0 %v3356_v44 }
0x1875   :  { %3359 = vmatpush3.bf16.msra.mxu0 %v3356_v44 }
0x193b   :  { %v3169_v52 = vpop.f32.mrb[20].mxu0 }
0x193c   :  { %v2463_v55 = vadd.f32 %v3169_v52, %v2851_v28  ;;  %v2457_v27 = vpop.f32.mrb[21].mxu0 }
0x193d   :  { %v2458_v56 = vadd.f32 %v2851_v28, %v2457_v27 }
0x193e   :  { %v2467_v59 = vadd.f32 %v2463_v55, %v4007_v40 }
0x193f   :  { %v2466_v61 = vadd.f32 %v2458_v56, %v4005_v13  ;;  %v2512_v13 = vld [vmem:[%s4258_s22] sm:$0xff] }
0x1940   :  { %v2473_v62 = vsel %vm94_vm0, %v2467_v59, 0.0  ;;  %v3336_v9 = vpack.c.bf16 %v2513_v8, %v2512_v13 }
0x1941   :  { %2474 = vadd.xlane.f32.xlu1 %v2473_v62  ;;  %v2470_v63 = vsel %vm94_vm0, %v2466_v61, 0.0 }
0x1942   :  { %2471 = vadd.xlane.f32.xlu0 %v2470_v63  ;;  %3337 = vmatprep.subr.bf16.mxu1 %v3336_v9 }
0x1943   :  { %3339 = vmatpush3.bf16.msra.mxu1 %v3336_v9 }
0x1944   :  { %3341 = vmatprep.subr.bf16.mxu1 %v3340_v48 }
0x1947   :  { %3343 = vmatpush3.bf16.msra.mxu1 %v3340_v48 }
0x19ce   :  { %v2475_v0 = vpop.xlane.xlu1 %2474 }
0x19cf   :  { %v2477_v1 = vmul.f32 0.03125, %v2475_v0  ;;  %v2472_v60 = vpop.xlane.xlu0 %2471 }
0x19d0   :  { %v2476_v2 = vmul.f32 0.03125, %v2472_v60 }
0x19d1   :  { %v2479_v3 = vsub.f32 %v2467_v59, %v2477_v1 }
0x19d2   :  { %v2478_v4 = vsub.f32 %v2466_v61, %v2476_v2  ;;  %v2859_v2 = vld [vmem:[%s4261_s25] ss:$0 sm:$0xff] }
0x19d3   :  { %v2481_v7 = vmul.f32 %v2479_v3, %v2479_v3 }
0x19d4   :  { %v2480_v5 = vmul.f32 %v2478_v4, %v2478_v4 }
0x19d5   :  { %v2485_v40 = vsel %vm94_vm0, %v2481_v7, 0.0 }
0x19d6   :  { %v2482_v6 = vsel %vm94_vm0, %v2480_v5, 0.0 }
0x19d7   :  { %2483 = vadd.xlane.f32.xlu0 %v2482_v6 }
0x19db   :  { %2486 = vadd.xlane.f32.xlu0 %v2485_v40 }
0x1a64   :  { %v2484_v12 = vpop.xlane.xlu0 %2483 }
0x1a65   :  { %v2488_v14 = vmul.f32 0.03125, %v2484_v12 }
0x1a67   :  { %v2490_v38 = vadd.f32 1e-12, %v2488_v14 }
0x1a68   :  { %v2487_v16 = vpop.xlane.xlu0 %2486 }
0x1a69   :  { %3536 = vrsqrt.f32 %v2490_v38  ;;  %v2489_v18 = vmul.f32 0.03125, %v2487_v16 }
0x1a6b   :  { %v2491_v19 = vadd.f32 1e-12, %v2489_v18 }
0x1a6d   :  { %3538 = vrsqrt.f32 %v2491_v19 }
0x1a73   :  { %v3537_v57 = vpop.eup %3536 }
0x1a74   :  { %v2494_v21 = vmul.f32 %v3537_v57, %v2478_v4 }
0x1a76   :  { %v2502_v22 = vmul.f32 %v2854_v20, %v2494_v21 }
0x1a77   :  { %v3539_v23 = vpop.eup %3538 }
0x1a78   :  { %v2495_v24 = vmul.f32 %v3539_v23, %v2479_v3  ;;  %v2510_v25 = vadd.f32 %v2855_v58, %v2502_v22 }
0x1a7a   :  { %v2503_v26 = vmul.f32 %v2854_v20, %v2495_v24  ;;  %3178 = vmatprep.mubr.msk.f32.mxu1 %vm94_vm0, %v2510_v25 }
0x1a7c   :  { %v2511_v29 = vadd.f32 %v2855_v58, %v2503_v26 }
0x1a7e   :  { %3179 = vmatmul.mubr.msk.f32.vlgmr.msra.gmra.mrb[22].mxu1 %vm94_vm0, %v2511_v29 }
0x1b51   :  { %v3180_v46 = vpop.f32.mrb[22].mxu1 }
0x1b52   :  { %v2601_v47 = vadd.f32 %v3180_v46, %v2856_v45  ;;  %v2595_v49 = vpop.f32.mrb[23].mxu1 }
0x1b53   :  { %v2596_v41 = vadd.f32 %v2856_v45, %v2595_v49 }
0x1b54   :  { %v2605_v50 = vmul.f32 %v2601_v47, %v2601_v47 }
0x1b55   :  { %v2604_v54 = vmul.f32 %v2596_v41, %v2596_v41 }
0x1b56   :  { %v2607_v53 = vmul.f32 %v2605_v50, %v2601_v47 }
0x1b57   :  { %v2606_v17 = vmul.f32 %v2604_v54, %v2596_v41 }
0x1b58   :  { %v2609_v51 = vmul.f32 0.044715, %v2607_v53 }
0x1b59   :  { %v2608_v15 = vmul.f32 0.044715, %v2606_v17 }
0x1b5a   :  { %v2611_v28 = vadd.f32 %v2609_v51, %v2601_v47 }
0x1b5b   :  { %v2610_v52 = vadd.f32 %v2608_v15, %v2596_v41 }
0x1b5c   :  { %v2613_v55 = vmul.f32 0.7978846, %v2611_v28 }
0x1b5d   :  { %v2612_v27 = vmul.f32 0.7978846, %v2610_v52 }
0x1b5e   :  { %3540 = vtanh.f32 %v2613_v55 }
0x1b5f   :  { %3542 = vtanh.f32 %v2612_v27 }
0x1b68   :  { %v3541_v56 = vpop.eup %3540 }
0x1b69   :  { %v3543_v59 = vpop.eup %3542  ;;  %v2617_v61 = vadd.f32 1.0, %v3541_v56 }
0x1b6a   :  { %v2616_v62 = vadd.f32 1.0, %v3543_v59 }
0x1b6b   :  { %v2619_v63 = vmul.f32 0.5, %v2617_v61 }
0x1b6c   :  { %v2618_v0 = vmul.f32 0.5, %v2616_v62 }
0x1b6d   :  { %v2621_v60 = vmul.f32 %v2619_v63, %v2601_v47 }
0x1b6e   :  { %v2620_v1 = vmul.f32 %v2618_v0, %v2596_v41 }
0x1b70   :  { %3197 = vmatprep.mubr.msk.f32.mxu0 %vm1326_vm5, %v2620_v1 }
0x1b71   :  { %3198 = vmatmul.mubr.msk.f32.vlgmr.msra.gmra.mrb[22].mxu0 %vm1326_vm5, %v2621_v60 }
0x1c44   :  { %v3199_v3 = vpop.f32.mrb[22].mxu0 }
0x1c45   :  { %v2715_v4 = vadd.f32 %v3199_v3, %v2859_v2  ;;  %v2709_v5 = vpop.f32.mrb[23].mxu0 }
0x1c46   :  { %v2710_v6 = vadd.f32 %v2859_v2, %v2709_v5 }
0x1c47   :  { %v2719_v7 = vadd.f32 %v2715_v4, %v2511_v29 }
0x1c48   :  { %v2718_v40 = vadd.f32 %v2710_v6, %v2510_v25  ;;  %v2862_v25 = vld [vmem:[%s4262_s26] ss:$0 sm:$0xff] }
0x1c49   :  { %v2725_v13 = vsel %vm94_vm0, %v2719_v7, 0.0 }
0x1c4a   :  { %2726 = vadd.xlane.f32.xlu1 %v2725_v13  ;;  %v2722_v8 = vsel %vm94_vm0, %v2718_v40, 0.0 }
0x1c4b   :  { %2723 = vadd.xlane.f32.xlu0 %v2722_v8 }
0x1cd7   :  { %v2727_v9 = vpop.xlane.xlu1 %2726 }
0x1cd8   :  { %v2729_v10 = vmul.f32 0.03125, %v2727_v9  ;;  %v2724_v11 = vpop.xlane.xlu0 %2723 }
0x1cd9   :  { %v2728_v48 = vmul.f32 0.03125, %v2724_v11 }
0x1cda   :  { %v2731_v12 = vsub.f32 %v2719_v7, %v2729_v10 }
0x1cdb   :  { %v2730_v14 = vsub.f32 %v2718_v40, %v2728_v48 }
0x1cdc   :  { %v2733_v38 = vmul.f32 %v2731_v12, %v2731_v12 }
0x1cdd   :  { %v2732_v16 = vmul.f32 %v2730_v14, %v2730_v14 }
0x1cde   :  { %v2737_v18 = vsel %vm94_vm0, %v2733_v38, 0.0 }
0x1cdf   :  { %2738 = vadd.xlane.f32.xlu1 %v2737_v18  ;;  %v2734_v19 = vsel %vm94_vm0, %v2732_v16, 0.0 }
0x1ce0   :  { %2735 = vadd.xlane.f32.xlu0 %v2734_v19 }
0x1d6c   :  { %v2739_v57 = vpop.xlane.xlu1 %2738 }
0x1d6d   :  { %v2741_v20 = vmul.f32 0.03125, %v2739_v57  ;;  %v2736_v21 = vpop.xlane.xlu0 %2735 }
0x1d6e   :  { %v2740_v58 = vmul.f32 0.03125, %v2736_v21 }
0x1d6f   :  { %v2743_v22 = vadd.f32 1e-12, %v2741_v20 }
0x1d70   :  { %v2742_v23 = vadd.f32 1e-12, %v2740_v58 }
0x1d71   :  { %3544 = vrsqrt.f32 %v2743_v22 }
0x1d72   :  { %3546 = vrsqrt.f32 %v2742_v23 }
0x1d7b   :  { %v3545_v24 = vpop.eup %3544 }
0x1d7c   :  { %v3547_v26 = vpop.eup %3546  ;;  %v2747_v29 = vmul.f32 %v3545_v24, %v2731_v12 }
0x1d7d   :  { %v2746_v31 = vmul.f32 %v3547_v26, %v2730_v14 }
0x1d7e   :  { %v2755_v34 = vmul.f32 %v2862_v25, %v2747_v29 }
0x1d7f   :  { %v2754_v35 = vmul.f32 %v2862_v25, %v2746_v31 }
0x1d80   :  { %v2763_v30 = vadd.f32 %v2863_v32, %v2755_v34 }
0x1d81   :  { %v2762_v33 = vadd.f32 %v2863_v32, %v2754_v35 }
0x1d82   :  { %2765 = vst.msk [vmem:[#allocation2 + $0x8] sm:$0xff] %vm94_vm0, %v2763_v30 }
0x1d83   :  { %2764 = vst.msk [vmem:[#allocation2] sm:$0xff] %vm94_vm0, %v2762_v33 }
0x1d84   :  { %3561 = shalt.err (!%p3558_p4)
}
0x1d85   :  { %s3562_s22 = scalar_lea.hbm %s4264_s28, 256 }
0x1d86   :  { %p3563_p5 = scmp.ne.s32.totalorder %s4264_s28, %s3562_s22  ;;  %p3566_p6 = scmp.lt.u32.totalorder %s3562_s22, %s4264_s28 }
0x1d88   :  { %p3568_p7 = pnand %p3566_p6, %p3563_p5 }
0x1d8a   :  { %3571 = shalt.err (!%p3568_p7)
}
0x1d8b   :  { %s3589_s6 = smov 128  }
0x1d8c   :  { %2777 = dma.vmem_to_hbm [thread:$0]  %s2772_s30, 256, %s4264_s28, [#allocation3], %s3589_s6, %s3589_s6, %s4321_s4  }
0x1d8d   :  { %3572 = dma.done.wait [#allocation3], 256  }
0x1d8e   :  { %3573 = vsyncadd [#allocation3], 4294967040 }
0x1d8f   :  { %2781 = vsyncpa [#allocation3], 1 }

</bundles_post_ra>
